<compile_context>
chip_gen: v7x
topology: tpu7x:2x2x1
jax: 0.10.0
libtpu: 0.0.40
codegen_flags: <defaults>
</compile_context>

<pallas_src>
import functools
import math

import jax
import jax.numpy as jnp
from jax.experimental import pallas as pl
from jax.experimental.pallas import tpu as pltpu


_SQRT2 = math.sqrt(2.0)
_EPS = 1e-8

_ROWS = 8        # packed rows: x1, y1, x2, y2, w, valid, pad, pad
_G_ROWS = 88     # 81 Gram entries + 6 normalization stats + 1 pad (multiple of 8)
_TB = 128        # batches per grid step == lane width


def _round_up(x: int, m: int) -> int:
    return ((x + m - 1) // m) * m


# ----------------------------------------------------------------------------
# Pallas kernel: fused Hartley normalization + weighted 9x9 Gram matrix
# ----------------------------------------------------------------------------
def _fundamental_kernel(pk_ref, out_ref, *, n_points: int):
    # pk_ref : (8, N_pad, TB) f32 - rows [x1, y1, x2, y2, w, valid, 0, 0];
    #          batches on the lane axis, correspondences on the sublane axis.
    # out_ref: (88, TB) f32 - rows 0..80 = G.flatten() (row-major),
    #          rows 81..86 = [mx1, my1, s1, mx2, my2, s2], row 87 unused.
    n_inv = jnp.float32(1.0 / n_points)

    x1 = pk_ref[0]          # (N_pad, TB)
    y1 = pk_ref[1]
    x2 = pk_ref[2]
    y2 = pk_ref[3]
    w = pk_ref[4]
    valid = pk_ref[5]       # 1.0 for real correspondences, 0.0 for N-padding

    # --- Hartley normalization (all TB batches in parallel on the lanes;
    #     reductions over N run down the sublane axis: VPU adds + tiny XLU). ---
    mx1 = jnp.sum(x1 * valid, axis=0, keepdims=True) * n_inv     # (1, TB)
    my1 = jnp.sum(y1 * valid, axis=0, keepdims=True) * n_inv
    mx2 = jnp.sum(x2 * valid, axis=0, keepdims=True) * n_inv
    my2 = jnp.sum(y2 * valid, axis=0, keepdims=True) * n_inv

    dx1 = x1 - mx1
    dy1 = y1 - my1
    dx2 = x2 - mx2
    dy2 = y2 - my2

    md1 = jnp.sum(jnp.sqrt(dx1 * dx1 + dy1 * dy1) * valid,
                  axis=0, keepdims=True) * n_inv
    md2 = jnp.sum(jnp.sqrt(dx2 * dx2 + dy2 * dy2) * valid,
                  axis=0, keepdims=True) * n_inv
    s1 = _SQRT2 / (md1 + _EPS)
    s2 = _SQRT2 / (md2 + _EPS)

    x1n = dx1 * s1
    y1n = dy1 * s1
    x2n = dx2 * s2
    y2n = dy2 * s2

    # --- 9 rows of X^T, each a lane-dense (N_pad, TB) array (pure VPU). ---
    ones = jnp.ones_like(x1n)
    feats = (x2n * x1n, x2n * y1n, x2n,
             y2n * x1n, y2n * y1n, y2n,
             x1n, y1n, ones)
    wfeats = tuple(w * f for f in feats)     # padded N rows have w == 0

    # --- G = X^T diag(w) X: 45 unique symmetric entries, mirrored. ---
    for i in range(9):
        for j in range(i, 9):
            g = jnp.sum(wfeats[i] * feats[j], axis=0, keepdims=True)   # (1, TB)
            out_ref[i * 9 + j: i * 9 + j + 1, :] = g
            if i != j:
                out_ref[j * 9 + i: j * 9 + i + 1, :] = g

    # --- per-batch normalization stats (to rebuild T1 / T2 in the wrapper) ---
    out_ref[81:82, :] = mx1
    out_ref[82:83, :] = my1
    out_ref[83:84, :] = s1
    out_ref[84:85, :] = mx2
    out_ref[85:86, :] = my2
    out_ref[86:87, :] = s2
    out_ref[87:88, :] = jnp.zeros_like(s2)


def _gram_and_norm(p1, p2, w):
    """Fused normalization + weighted-Gram Pallas kernel.

    p1, p2: (B, N, 2) f32;  w: (B, N) f32
    Returns (G, stats): G (B, 9, 9) f32, stats (6, B) = [mx1, my1, s1, mx2, my2, s2].
    """
    B, N, _ = p1.shape
    n_pad = _round_up(max(N, 8), 8)
    b_pad = _round_up(max(B, 1), _TB)

    def pack_nb(a):   # (B, N) -> (N_pad, B_pad), zero padded
        a = jnp.transpose(a)
        return jnp.pad(a, ((0, n_pad - N), (0, b_pad - B)))

    valid = jnp.pad(jnp.ones((N, B), jnp.float32),
                    ((0, n_pad - N), (0, b_pad - B)))
    zeros = jnp.zeros((n_pad, b_pad), jnp.float32)
    packed = jnp.stack(
        [pack_nb(p1[:, :, 0]), pack_nb(p1[:, :, 1]),
         pack_nb(p2[:, :, 0]), pack_nb(p2[:, :, 1]),
         pack_nb(w), valid, zeros, zeros],
        axis=0,
    )  # (8, N_pad, B_pad), lane-dense

    # TODO(synk): for very large N (>~2K correspondences) add a second
    # "arbitrary" grid axis over N blocks with a VMEM accumulator (P3 pattern);
    # one N block per step is plenty for typical SLAM correspondence counts.
    out = pl.pallas_call(
        functools.partial(_fundamental_kernel, n_points=N),
        out_shape=jax.ShapeDtypeStruct((_G_ROWS, b_pad), jnp.float32),
        grid=(b_pad // _TB,),
        in_specs=[pl.BlockSpec((_ROWS, n_pad, _TB), lambda t: (0, 0, t))],
        out_specs=pl.BlockSpec((_G_ROWS, _TB), lambda t: (0, t)),
        compiler_params=pltpu.CompilerParams(
            dimension_semantics=("parallel",)),
    )(packed)

    out = out[:, :B]                                   # drop batch padding
    G = jnp.transpose(out[:81]).reshape(B, 9, 9)       # row-major: k = i*9 + j
    stats = out[81:87]                                 # (6, B)
    return G, stats


# ----------------------------------------------------------------------------
# Plain-JAX glue (transform rebuild, SVDs, denormalization)
# ----------------------------------------------------------------------------
def _transform_from_stats(scale, mx, my):
    z = jnp.zeros_like(scale)
    o = jnp.ones_like(scale)
    return jnp.stack(
        [scale, z, -scale * mx,
         z, scale, -scale * my,
         z, z, o],
        axis=-1,
    ).reshape(scale.shape + (3, 3))


def normalize_transformation(M: jax.Array, eps: float = 1e-8) -> jax.Array:
    norm_val = M[..., -1:, -1:]
    # sign-aware epsilon: never cancels a negative norm_val close to -eps
    denom = jnp.where(norm_val >= 0, norm_val + eps, norm_val - eps)
    return jnp.where(jnp.abs(norm_val) > eps, M / denom, M)


def find_fundamental(p1: jax.Array, p2: jax.Array, mask: jax.Array) -> jax.Array:
    """Weighted 8-point fundamental matrix estimation.

    p1, p2: (*, N, 2)   mask: (*, N)   ->   (*, 3, 3)
    """
    batch_shape = p1.shape[:-2]
    N = p1.shape[-2]
    p1f = p1.reshape((-1, N, 2)).astype(jnp.float32)
    p2f = p2.reshape((-1, N, 2)).astype(jnp.float32)
    wf = mask.reshape((-1, N)).astype(jnp.float32)
    B = p1f.shape[0]

    # Hot path: fused Hartley normalization + weighted 9x9 Gram matrix.
    G, stats = _gram_and_norm(p1f, p2f, wf)            # (B,9,9), (6,B)
    mx1, my1, s1, mx2, my2, s2 = (stats[i] for i in range(6))
    T1 = _transform_from_stats(s1, mx1, my1)
    T2 = _transform_from_stats(s2, mx2, my2)

    # Null-space vector = right singular vector of the smallest singular value.
    _, _, Vh = jnp.linalg.svd(G)
    F_mat = Vh[..., -1, :].reshape((B, 3, 3))

    # Enforce rank-2 constraint.
    U, S, Vh2 = jnp.linalg.svd(F_mat)
    S = S.at[..., -1].set(0.0)
    F_proj = jnp.matmul(U * S[..., None, :], Vh2)

    # Denormalize:  F = T2^T  F_proj  T1, then scale so F[2,2] == 1.
    F_est = jnp.matmul(jnp.swapaxes(T2, -1, -2), jnp.matmul(F_proj, T1))
    F_est = normalize_transformation(F_est)
    return F_est.reshape(batch_shape + (3, 3))


def fundamental_forward(p1, p2, mask, camera_model: str = "pinhole"):
    """JAX/Pallas equivalent of torchslam Fundamental.forward."""
    if camera_model == "pinhole":
        return find_fundamental(p1, p2, mask)
    # TODO(synk): equirectangular camera model not implemented (no reference math in module).
    raise NotImplementedError(camera_model)


# ----------------------------------------------------------------------------
if __name__ == "__main__":
    key = jax.random.PRNGKey(0)
    k1, k2, k3 = jax.random.split(key, 3)

    B, N = 2, 16
    p1 = jax.random.normal(k1, (B, N, 2), dtype=jnp.float32)
    p2 = p1 + 0.05 * jax.random.normal(k2, (B, N, 2), dtype=jnp.float32)
    mask = (jax.random.uniform(k3, (B, N)) > 0.2).astype(jnp.float32)

    F = fundamental_forward(p1, p2, mask, camera_model="pinhole")
    F = jax.block_until_ready(F)

    assert F.shape == (B, 3, 3), F.shape
    assert bool(jnp.all(jnp.isfinite(F)))
    print("KERNEL_OK")
</pallas_src>

<mosaic_0001>
module attributes {stable_mosaic.version = 11 : i64} {
  func.func @_fundamental_kernel(%arg0: i32, %arg1: memref<8x16x128xf32, #tpu.memory_space<vmem>>, %arg2: memref<88x128xf32, #tpu.memory_space<vmem>>) attributes {dimension_semantics = [#tpu.dimension_semantics<parallel>], iteration_bounds = array<i64: 1>, scalar_prefetch = 0 : i64, scratch_operands = 0 : i64, tpu.core_type = #tpu.core_type<tc>, window_params = [{transform_indices = @transform_0, window_bounds = array<i64: 8, 16, 128>}, {transform_indices = @transform_1, window_bounds = array<i64: 88, 128>}]} {
    %c0 = arith.constant 0 : index
    %c0_0 = arith.constant 0 : index
    %c0_1 = arith.constant 0 : index
    %0 = vector.load %arg1[%c0, %c0_0, %c0_1] : memref<8x16x128xf32, #tpu.memory_space<vmem>>, vector<1x16x128xf32>
    %1 = vector.shape_cast %0 : vector<1x16x128xf32> to vector<16x128xf32>
    %c1 = arith.constant 1 : index
    %c0_2 = arith.constant 0 : index
    %c0_3 = arith.constant 0 : index
    %2 = vector.load %arg1[%c1, %c0_2, %c0_3] : memref<8x16x128xf32, #tpu.memory_space<vmem>>, vector<1x16x128xf32>
    %3 = vector.shape_cast %2 : vector<1x16x128xf32> to vector<16x128xf32>
    %c2 = arith.constant 2 : index
    %c0_4 = arith.constant 0 : index
    %c0_5 = arith.constant 0 : index
    %4 = vector.load %arg1[%c2, %c0_4, %c0_5] : memref<8x16x128xf32, #tpu.memory_space<vmem>>, vector<1x16x128xf32>
    %5 = vector.shape_cast %4 : vector<1x16x128xf32> to vector<16x128xf32>
    %c3 = arith.constant 3 : index
    %c0_6 = arith.constant 0 : index
    %c0_7 = arith.constant 0 : index
    %6 = vector.load %arg1[%c3, %c0_6, %c0_7] : memref<8x16x128xf32, #tpu.memory_space<vmem>>, vector<1x16x128xf32>
    %7 = vector.shape_cast %6 : vector<1x16x128xf32> to vector<16x128xf32>
    %c4 = arith.constant 4 : index
    %c0_8 = arith.constant 0 : index
    %c0_9 = arith.constant 0 : index
    %8 = vector.load %arg1[%c4, %c0_8, %c0_9] : memref<8x16x128xf32, #tpu.memory_space<vmem>>, vector<1x16x128xf32>
    %9 = vector.shape_cast %8 : vector<1x16x128xf32> to vector<16x128xf32>
    %c5 = arith.constant 5 : index
    %c0_10 = arith.constant 0 : index
    %c0_11 = arith.constant 0 : index
    %10 = vector.load %arg1[%c5, %c0_10, %c0_11] : memref<8x16x128xf32, #tpu.memory_space<vmem>>, vector<1x16x128xf32>
    %11 = vector.shape_cast %10 : vector<1x16x128xf32> to vector<16x128xf32>
    %12 = arith.mulf %1, %11 : vector<16x128xf32>
    %cst = arith.constant dense<0.000000e+00> : vector<128xf32>
    %13 = vector.multi_reduction <add>, %12, %cst [0] : vector<16x128xf32> to vector<128xf32>
    %14 = vector.shape_cast %13 : vector<128xf32> to vector<1x128xf32>
    %cst_12 = arith.constant 6.250000e-02 : f32
    %15 = vector.broadcast %cst_12 : f32 to vector<1x128xf32>
    %16 = arith.mulf %14, %15 : vector<1x128xf32>
    %17 = arith.mulf %3, %11 : vector<16x128xf32>
    %cst_13 = arith.constant dense<0.000000e+00> : vector<128xf32>
    %18 = vector.multi_reduction <add>, %17, %cst_13 [0] : vector<16x128xf32> to vector<128xf32>
    %19 = vector.shape_cast %18 : vector<128xf32> to vector<1x128xf32>
    %cst_14 = arith.constant 6.250000e-02 : f32
    %20 = vector.broadcast %cst_14 : f32 to vector<1x128xf32>
    %21 = arith.mulf %19, %20 : vector<1x128xf32>
    %22 = arith.mulf %5, %11 : vector<16x128xf32>
    %cst_15 = arith.constant dense<0.000000e+00> : vector<128xf32>
    %23 = vector.multi_reduction <add>, %22, %cst_15 [0] : vector<16x128xf32> to vector<128xf32>
    %24 = vector.shape_cast %23 : vector<128xf32> to vector<1x128xf32>
    %cst_16 = arith.constant 6.250000e-02 : f32
    %25 = vector.broadcast %cst_16 : f32 to vector<1x128xf32>
    %26 = arith.mulf %24, %25 : vector<1x128xf32>
    %27 = arith.mulf %7, %11 : vector<16x128xf32>
    %cst_17 = arith.constant dense<0.000000e+00> : vector<128xf32>
    %28 = vector.multi_reduction <add>, %27, %cst_17 [0] : vector<16x128xf32> to vector<128xf32>
    %29 = vector.shape_cast %28 : vector<128xf32> to vector<1x128xf32>
    %cst_18 = arith.constant 6.250000e-02 : f32
    %30 = vector.broadcast %cst_18 : f32 to vector<1x128xf32>
    %31 = arith.mulf %29, %30 : vector<1x128xf32>
    %32 = vector.broadcast %16 : vector<1x128xf32> to vector<16x128xf32>
    %33 = arith.subf %1, %32 : vector<16x128xf32>
    %34 = vector.broadcast %21 : vector<1x128xf32> to vector<16x128xf32>
    %35 = arith.subf %3, %34 : vector<16x128xf32>
    %36 = vector.broadcast %26 : vector<1x128xf32> to vector<16x128xf32>
    %37 = arith.subf %5, %36 : vector<16x128xf32>
    %38 = vector.broadcast %31 : vector<1x128xf32> to vector<16x128xf32>
    %39 = arith.subf %7, %38 : vector<16x128xf32>
    %40 = arith.mulf %33, %33 : vector<16x128xf32>
    %41 = arith.mulf %35, %35 : vector<16x128xf32>
    %42 = arith.addf %40, %41 : vector<16x128xf32>
    %43 = math.sqrt %42 : vector<16x128xf32>
    %44 = arith.mulf %43, %11 : vector<16x128xf32>
    %cst_19 = arith.constant dense<0.000000e+00> : vector<128xf32>
    %45 = vector.multi_reduction <add>, %44, %cst_19 [0] : vector<16x128xf32> to vector<128xf32>
    %46 = vector.shape_cast %45 : vector<128xf32> to vector<1x128xf32>
    %cst_20 = arith.constant 6.250000e-02 : f32
    %47 = vector.broadcast %cst_20 : f32 to vector<1x128xf32>
    %48 = arith.mulf %46, %47 : vector<1x128xf32>
    %49 = arith.mulf %37, %37 : vector<16x128xf32>
    %50 = arith.mulf %39, %39 : vector<16x128xf32>
    %51 = arith.addf %49, %50 : vector<16x128xf32>
    %52 = math.sqrt %51 : vector<16x128xf32>
    %53 = arith.mulf %52, %11 : vector<16x128xf32>
    %cst_21 = arith.constant dense<0.000000e+00> : vector<128xf32>
    %54 = vector.multi_reduction <add>, %53, %cst_21 [0] : vector<16x128xf32> to vector<128xf32>
    %55 = vector.shape_cast %54 : vector<128xf32> to vector<1x128xf32>
    %cst_22 = arith.constant 6.250000e-02 : f32
    %56 = vector.broadcast %cst_22 : f32 to vector<1x128xf32>
    %57 = arith.mulf %55, %56 : vector<1x128xf32>
    %cst_23 = arith.constant 9.99999993E-9 : f32
    %58 = vector.broadcast %cst_23 : f32 to vector<1x128xf32>
    %59 = arith.addf %48, %58 : vector<1x128xf32>
    %cst_24 = arith.constant 1.41421354 : f32
    %60 = vector.broadcast %cst_24 : f32 to vector<1x128xf32>
    %61 = arith.divf %60, %59 : vector<1x128xf32>
    %cst_25 = arith.constant 9.99999993E-9 : f32
    %62 = vector.broadcast %cst_25 : f32 to vector<1x128xf32>
    %63 = arith.addf %57, %62 : vector<1x128xf32>
    %cst_26 = arith.constant 1.41421354 : f32
    %64 = vector.broadcast %cst_26 : f32 to vector<1x128xf32>
    %65 = arith.divf %64, %63 : vector<1x128xf32>
    %66 = vector.broadcast %61 : vector<1x128xf32> to vector<16x128xf32>
    %67 = arith.mulf %33, %66 : vector<16x128xf32>
    %68 = vector.broadcast %61 : vector<1x128xf32> to vector<16x128xf32>
    %69 = arith.mulf %35, %68 : vector<16x128xf32>
    %70 = vector.broadcast %65 : vector<1x128xf32> to vector<16x128xf32>
    %71 = arith.mulf %37, %70 : vector<16x128xf32>
    %72 = vector.broadcast %65 : vector<1x128xf32> to vector<16x128xf32>
    %73 = arith.mulf %39, %72 : vector<16x128xf32>
    %cst_27 = arith.constant 1.000000e+00 : f32
    %74 = vector.broadcast %cst_27 : f32 to vector<16x128xf32>
    %75 = arith.mulf %71, %67 : vector<16x128xf32>
    %76 = arith.mulf %71, %69 : vector<16x128xf32>
    %77 = arith.mulf %73, %67 : vector<16x128xf32>
    %78 = arith.mulf %73, %69 : vector<16x128xf32>
    %79 = arith.mulf %9, %75 : vector<16x128xf32>
    %80 = arith.mulf %9, %76 : vector<16x128xf32>
    %81 = arith.mulf %9, %71 : vector<16x128xf32>
    %82 = arith.mulf %9, %77 : vector<16x128xf32>
    %83 = arith.mulf %9, %78 : vector<16x128xf32>
    %84 = arith.mulf %9, %73 : vector<16x128xf32>
    %85 = arith.mulf %9, %67 : vector<16x128xf32>
    %86 = arith.mulf %9, %69 : vector<16x128xf32>
    %87 = arith.mulf %9, %74 : vector<16x128xf32>
    %88 = arith.mulf %79, %75 : vector<16x128xf32>
    %cst_28 = arith.constant dense<0.000000e+00> : vector<128xf32>
    %89 = vector.multi_reduction <add>, %88, %cst_28 [0] : vector<16x128xf32> to vector<128xf32>
    %90 = vector.shape_cast %89 : vector<128xf32> to vector<1x128xf32>
    %c0_29 = arith.constant 0 : index
    %c0_30 = arith.constant 0 : index
    %91 = vector.load %arg2[%c0_29, %c0_30] : memref<88x128xf32, #tpu.memory_space<vmem>>, vector<1x128xf32>
    tpu.vector_store %arg2[%c0_29, %c0_30], %90 {strides = array<i32>} : memref<88x128xf32, #tpu.memory_space<vmem>>, vector<1x128xf32>,
    %92 = arith.mulf %79, %76 : vector<16x128xf32>
    %cst_31 = arith.constant dense<0.000000e+00> : vector<128xf32>
    %93 = vector.multi_reduction <add>, %92, %cst_31 [0] : vector<16x128xf32> to vector<128xf32>
    %94 = vector.shape_cast %93 : vector<128xf32> to vector<1x128xf32>
    %c1_32 = arith.constant 1 : index
    %c0_33 = arith.constant 0 : index
    %95 = vector.load %arg2[%c1_32, %c0_33] : memref<88x128xf32, #tpu.memory_space<vmem>>, vector<1x128xf32>
    tpu.vector_store %arg2[%c1_32, %c0_33], %94 {strides = array<i32>} : memref<88x128xf32, #tpu.memory_space<vmem>>, vector<1x128xf32>,
    %c9 = arith.constant 9 : index
    %c0_34 = arith.constant 0 : index
    %96 = vector.load %arg2[%c9, %c0_34] : memref<88x128xf32, #tpu.memory_space<vmem>>, vector<1x128xf32>
    tpu.vector_store %arg2[%c9, %c0_34], %94 {strides = array<i32>} : memref<88x128xf32, #tpu.memory_space<vmem>>, vector<1x128xf32>,
    %97 = arith.mulf %79, %71 : vector<16x128xf32>
    %cst_35 = arith.constant dense<0.000000e+00> : vector<128xf32>
    %98 = vector.multi_reduction <add>, %97, %cst_35 [0] : vector<16x128xf32> to vector<128xf32>
    %99 = vector.shape_cast %98 : vector<128xf32> to vector<1x128xf32>
    %c2_36 = arith.constant 2 : index
    %c0_37 = arith.constant 0 : index
    %100 = vector.load %arg2[%c2_36, %c0_37] : memref<88x128xf32, #tpu.memory_space<vmem>>, vector<1x128xf32>
    tpu.vector_store %arg2[%c2_36, %c0_37], %99 {strides = array<i32>} : memref<88x128xf32, #tpu.memory_space<vmem>>, vector<1x128xf32>,
    %c18 = arith.constant 18 : index
    %c0_38 = arith.constant 0 : index
    %101 = vector.load %arg2[%c18, %c0_38] : memref<88x128xf32, #tpu.memory_space<vmem>>, vector<1x128xf32>
    tpu.vector_store %arg2[%c18, %c0_38], %99 {strides = array<i32>} : memref<88x128xf32, #tpu.memory_space<vmem>>, vector<1x128xf32>,
    %102 = arith.mulf %79, %77 : vector<16x128xf32>
    %cst_39 = arith.constant dense<0.000000e+00> : vector<128xf32>
    %103 = vector.multi_reduction <add>, %102, %cst_39 [0] : vector<16x128xf32> to vector<128xf32>
    %104 = vector.shape_cast %103 : vector<128xf32> to vector<1x128xf32>
    %c3_40 = arith.constant 3 : index
    %c0_41 = arith.constant 0 : index
    %105 = vector.load %arg2[%c3_40, %c0_41] : memref<88x128xf32, #tpu.memory_space<vmem>>, vector<1x128xf32>
    tpu.vector_store %arg2[%c3_40, %c0_41], %104 {strides = array<i32>} : memref<88x128xf32, #tpu.memory_space<vmem>>, vector<1x128xf32>,
    %c27 = arith.constant 27 : index
    %c0_42 = arith.constant 0 : index
    %106 = vector.load %arg2[%c27, %c0_42] : memref<88x128xf32, #tpu.memory_space<vmem>>, vector<1x128xf32>
    tpu.vector_store %arg2[%c27, %c0_42], %104 {strides = array<i32>} : memref<88x128xf32, #tpu.memory_space<vmem>>, vector<1x128xf32>,
    %107 = arith.mulf %79, %78 : vector<16x128xf32>
    %cst_43 = arith.constant dense<0.000000e+00> : vector<128xf32>
    %108 = vector.multi_reduction <add>, %107, %cst_43 [0] : vector<16x128xf32> to vector<128xf32>
    %109 = vector.shape_cast %108 : vector<128xf32> to vector<1x128xf32>
    %c4_44 = arith.constant 4 : index
    %c0_45 = arith.constant 0 : index
    %110 = vector.load %arg2[%c4_44, %c0_45] : memref<88x128xf32, #tpu.memory_space<vmem>>, vector<1x128xf32>
    tpu.vector_store %arg2[%c4_44, %c0_45], %109 {strides = array<i32>} : memref<88x128xf32, #tpu.memory_space<vmem>>, vector<1x128xf32>,
    %c36 = arith.constant 36 : index
    %c0_46 = arith.constant 0 : index
    %111 = vector.load %arg2[%c36, %c0_46] : memref<88x128xf32, #tpu.memory_space<vmem>>, vector<1x128xf32>
    tpu.vector_store %arg2[%c36, %c0_46], %109 {strides = array<i32>} : memref<88x128xf32, #tpu.memory_space<vmem>>, vector<1x128xf32>,
    %112 = arith.mulf %79, %73 : vector<16x128xf32>
    %cst_47 = arith.constant dense<0.000000e+00> : vector<128xf32>
    %113 = vector.multi_reduction <add>, %112, %cst_47 [0] : vector<16x128xf32> to vector<128xf32>
    %114 = vector.shape_cast %113 : vector<128xf32> to vector<1x128xf32>
    %c5_48 = arith.constant 5 : index
    %c0_49 = arith.constant 0 : index
    %115 = vector.load %arg2[%c5_48, %c0_49] : memref<88x128xf32, #tpu.memory_space<vmem>>, vector<1x128xf32>
    tpu.vector_store %arg2[%c5_48, %c0_49], %114 {strides = array<i32>} : memref<88x128xf32, #tpu.memory_space<vmem>>, vector<1x128xf32>,
    %c45 = arith.constant 45 : index
    %c0_50 = arith.constant 0 : index
    %116 = vector.load %arg2[%c45, %c0_50] : memref<88x128xf32, #tpu.memory_space<vmem>>, vector<1x128xf32>
    tpu.vector_store %arg2[%c45, %c0_50], %114 {strides = array<i32>} : memref<88x128xf32, #tpu.memory_space<vmem>>, vector<1x128xf32>,
    %117 = arith.mulf %79, %67 : vector<16x128xf32>
    %cst_51 = arith.constant dense<0.000000e+00> : vector<128xf32>
    %118 = vector.multi_reduction <add>, %117, %cst_51 [0] : vector<16x128xf32> to vector<128xf32>
    %119 = vector.shape_cast %118 : vector<128xf32> to vector<1x128xf32>
    %c6 = arith.constant 6 : index
    %c0_52 = arith.constant 0 : index
    %120 = vector.load %arg2[%c6, %c0_52] : memref<88x128xf32, #tpu.memory_space<vmem>>, vector<1x128xf32>
    tpu.vector_store %arg2[%c6, %c0_52], %119 {strides = array<i32>} : memref<88x128xf32, #tpu.memory_space<vmem>>, vector<1x128xf32>,
    %c54 = arith.constant 54 : index
    %c0_53 = arith.constant 0 : index
    %121 = vector.load %arg2[%c54, %c0_53] : memref<88x128xf32, #tpu.memory_space<vmem>>, vector<1x128xf32>
    tpu.vector_store %arg2[%c54, %c0_53], %119 {strides = array<i32>} : memref<88x128xf32, #tpu.memory_space<vmem>>, vector<1x128xf32>,
    %122 = arith.mulf %79, %69 : vector<16x128xf32>
    %cst_54 = arith.constant dense<0.000000e+00> : vector<128xf32>
    %123 = vector.multi_reduction <add>, %122, %cst_54 [0] : vector<16x128xf32> to vector<128xf32>
    %124 = vector.shape_cast %123 : vector<128xf32> to vector<1x128xf32>
    %c7 = arith.constant 7 : index
    %c0_55 = arith.constant 0 : index
    %125 = vector.load %arg2[%c7, %c0_55] : memref<88x128xf32, #tpu.memory_space<vmem>>, vector<1x128xf32>
    tpu.vector_store %arg2[%c7, %c0_55], %124 {strides = array<i32>} : memref<88x128xf32, #tpu.memory_space<vmem>>, vector<1x128xf32>,
    %c63 = arith.constant 63 : index
    %c0_56 = arith.constant 0 : index
    %126 = vector.load %arg2[%c63, %c0_56] : memref<88x128xf32, #tpu.memory_space<vmem>>, vector<1x128xf32>
    tpu.vector_store %arg2[%c63, %c0_56], %124 {strides = array<i32>} : memref<88x128xf32, #tpu.memory_space<vmem>>, vector<1x128xf32>,
    %127 = arith.mulf %79, %74 : vector<16x128xf32>
    %cst_57 = arith.constant dense<0.000000e+00> : vector<128xf32>
    %128 = vector.multi_reduction <add>, %127, %cst_57 [0] : vector<16x128xf32> to vector<128xf32>
    %129 = vector.shape_cast %128 : vector<128xf32> to vector<1x128xf32>
    %c8 = arith.constant 8 : index
    %c0_58 = arith.constant 0 : index
    %130 = vector.load %arg2[%c8, %c0_58] : memref<88x128xf32, #tpu.memory_space<vmem>>, vector<1x128xf32>
    tpu.vector_store %arg2[%c8, %c0_58], %129 {strides = array<i32>} : memref<88x128xf32, #tpu.memory_space<vmem>>, vector<1x128xf32>,
    %c72 = arith.constant 72 : index
    %c0_59 = arith.constant 0 : index
    %131 = vector.load %arg2[%c72, %c0_59] : memref<88x128xf32, #tpu.memory_space<vmem>>, vector<1x128xf32>
    tpu.vector_store %arg2[%c72, %c0_59], %129 {strides = array<i32>} : memref<88x128xf32, #tpu.memory_space<vmem>>, vector<1x128xf32>,
    %132 = arith.mulf %80, %76 : vector<16x128xf32>
    %cst_60 = arith.constant dense<0.000000e+00> : vector<128xf32>
    %133 = vector.multi_reduction <add>, %132, %cst_60 [0] : vector<16x128xf32> to vector<128xf32>
    %134 = vector.shape_cast %133 : vector<128xf32> to vector<1x128xf32>
    %c10 = arith.constant 10 : index
    %c0_61 = arith.constant 0 : index
    %135 = vector.load %arg2[%c10, %c0_61] : memref<88x128xf32, #tpu.memory_space<vmem>>, vector<1x128xf32>
    tpu.vector_store %arg2[%c10, %c0_61], %134 {strides = array<i32>} : memref<88x128xf32, #tpu.memory_space<vmem>>, vector<1x128xf32>,
    %136 = arith.mulf %80, %71 : vector<16x128xf32>
    %cst_62 = arith.constant dense<0.000000e+00> : vector<128xf32>
    %137 = vector.multi_reduction <add>, %136, %cst_62 [0] : vector<16x128xf32> to vector<128xf32>
    %138 = vector.shape_cast %137 : vector<128xf32> to vector<1x128xf32>
    %c11 = arith.constant 11 : index
    %c0_63 = arith.constant 0 : index
    %139 = vector.load %arg2[%c11, %c0_63] : memref<88x128xf32, #tpu.memory_space<vmem>>, vector<1x128xf32>
    tpu.vector_store %arg2[%c11, %c0_63], %138 {strides = array<i32>} : memref<88x128xf32, #tpu.memory_space<vmem>>, vector<1x128xf32>,
    %c19 = arith.constant 19 : index
    %c0_64 = arith.constant 0 : index
    %140 = vector.load %arg2[%c19, %c0_64] : memref<88x128xf32, #tpu.memory_space<vmem>>, vector<1x128xf32>
    tpu.vector_store %arg2[%c19, %c0_64], %138 {strides = array<i32>} : memref<88x128xf32, #tpu.memory_space<vmem>>, vector<1x128xf32>,
    %141 = arith.mulf %80, %77 : vector<16x128xf32>
    %cst_65 = arith.constant dense<0.000000e+00> : vector<128xf32>
    %142 = vector.multi_reduction <add>, %141, %cst_65 [0] : vector<16x128xf32> to vector<128xf32>
    %143 = vector.shape_cast %142 : vector<128xf32> to vector<1x128xf32>
    %c12 = arith.constant 12 : index
    %c0_66 = arith.constant 0 : index
    %144 = vector.load %arg2[%c12, %c0_66] : memref<88x128xf32, #tpu.memory_space<vmem>>, vector<1x128xf32>
    tpu.vector_store %arg2[%c12, %c0_66], %143 {strides = array<i32>} : memref<88x128xf32, #tpu.memory_space<vmem>>, vector<1x128xf32>,
    %c28 = arith.constant 28 : index
    %c0_67 = arith.constant 0 : index
    %145 = vector.load %arg2[%c28, %c0_67] : memref<88x128xf32, #tpu.memory_space<vmem>>, vector<1x128xf32>
    tpu.vector_store %arg2[%c28, %c0_67], %143 {strides = array<i32>} : memref<88x128xf32, #tpu.memory_space<vmem>>, vector<1x128xf32>,
    %146 = arith.mulf %80, %78 : vector<16x128xf32>
    %cst_68 = arith.constant dense<0.000000e+00> : vector<128xf32>
    %147 = vector.multi_reduction <add>, %146, %cst_68 [0] : vector<16x128xf32> to vector<128xf32>
    %148 = vector.shape_cast %147 : vector<128xf32> to vector<1x128xf32>
    %c13 = arith.constant 13 : index
    %c0_69 = arith.constant 0 : index
    %149 = vector.load %arg2[%c13, %c0_69] : memref<88x128xf32, #tpu.memory_space<vmem>>, vector<1x128xf32>
    tpu.vector_store %arg2[%c13, %c0_69], %148 {strides = array<i32>} : memref<88x128xf32, #tpu.memory_space<vmem>>, vector<1x128xf32>,
    %c37 = arith.constant 37 : index
    %c0_70 = arith.constant 0 : index
    %150 = vector.load %arg2[%c37, %c0_70] : memref<88x128xf32, #tpu.memory_space<vmem>>, vector<1x128xf32>
    tpu.vector_store %arg2[%c37, %c0_70], %148 {strides = array<i32>} : memref<88x128xf32, #tpu.memory_space<vmem>>, vector<1x128xf32>,
    %151 = arith.mulf %80, %73 : vector<16x128xf32>
    %cst_71 = arith.constant dense<0.000000e+00> : vector<128xf32>
    %152 = vector.multi_reduction <add>, %151, %cst_71 [0] : vector<16x128xf32> to vector<128xf32>
    %153 = vector.shape_cast %152 : vector<128xf32> to vector<1x128xf32>
    %c14 = arith.constant 14 : index
    %c0_72 = arith.constant 0 : index
    %154 = vector.load %arg2[%c14, %c0_72] : memref<88x128xf32, #tpu.memory_space<vmem>>, vector<1x128xf32>
    tpu.vector_store %arg2[%c14, %c0_72], %153 {strides = array<i32>} : memref<88x128xf32, #tpu.memory_space<vmem>>, vector<1x128xf32>,
    %c46 = arith.constant 46 : index
    %c0_73 = arith.constant 0 : index
    %155 = vector.load %arg2[%c46, %c0_73] : memref<88x128xf32, #tpu.memory_space<vmem>>, vector<1x128xf32>
    tpu.vector_store %arg2[%c46, %c0_73], %153 {strides = array<i32>} : memref<88x128xf32, #tpu.memory_space<vmem>>, vector<1x128xf32>,
    %156 = arith.mulf %80, %67 : vector<16x128xf32>
    %cst_74 = arith.constant dense<0.000000e+00> : vector<128xf32>
    %157 = vector.multi_reduction <add>, %156, %cst_74 [0] : vector<16x128xf32> to vector<128xf32>
    %158 = vector.shape_cast %157 : vector<128xf32> to vector<1x128xf32>
    %c15 = arith.constant 15 : index
    %c0_75 = arith.constant 0 : index
    %159 = vector.load %arg2[%c15, %c0_75] : memref<88x128xf32, #tpu.memory_space<vmem>>, vector<1x128xf32>
    tpu.vector_store %arg2[%c15, %c0_75], %158 {strides = array<i32>} : memref<88x128xf32, #tpu.memory_space<vmem>>, vector<1x128xf32>,
    %c55 = arith.constant 55 : index
    %c0_76 = arith.constant 0 : index
    %160 = vector.load %arg2[%c55, %c0_76] : memref<88x128xf32, #tpu.memory_space<vmem>>, vector<1x128xf32>
    tpu.vector_store %arg2[%c55, %c0_76], %158 {strides = array<i32>} : memref<88x128xf32, #tpu.memory_space<vmem>>, vector<1x128xf32>,
    %161 = arith.mulf %80, %69 : vector<16x128xf32>
    %cst_77 = arith.constant dense<0.000000e+00> : vector<128xf32>
    %162 = vector.multi_reduction <add>, %161, %cst_77 [0] : vector<16x128xf32> to vector<128xf32>
    %163 = vector.shape_cast %162 : vector<128xf32> to vector<1x128xf32>
    %c16 = arith.constant 16 : index
    %c0_78 = arith.constant 0 : index
    %164 = vector.load %arg2[%c16, %c0_78] : memref<88x128xf32, #tpu.memory_space<vmem>>, vector<1x128xf32>
    tpu.vector_store %arg2[%c16, %c0_78], %163 {strides = array<i32>} : memref<88x128xf32, #tpu.memory_space<vmem>>, vector<1x128xf32>,
    %c64 = arith.constant 64 : index
    %c0_79 = arith.constant 0 : index
    %165 = vector.load %arg2[%c64, %c0_79] : memref<88x128xf32, #tpu.memory_space<vmem>>, vector<1x128xf32>
    tpu.vector_store %arg2[%c64, %c0_79], %163 {strides = array<i32>} : memref<88x128xf32, #tpu.memory_space<vmem>>, vector<1x128xf32>,
    %166 = arith.mulf %80, %74 : vector<16x128xf32>
    %cst_80 = arith.constant dense<0.000000e+00> : vector<128xf32>
    %167 = vector.multi_reduction <add>, %166, %cst_80 [0] : vector<16x128xf32> to vector<128xf32>
    %168 = vector.shape_cast %167 : vector<128xf32> to vector<1x128xf32>
    %c17 = arith.constant 17 : index
    %c0_81 = arith.constant 0 : index
    %169 = vector.load %arg2[%c17, %c0_81] : memref<88x128xf32, #tpu.memory_space<vmem>>, vector<1x128xf32>
    tpu.vector_store %arg2[%c17, %c0_81], %168 {strides = array<i32>} : memref<88x128xf32, #tpu.memory_space<vmem>>, vector<1x128xf32>,
    %c73 = arith.constant 73 : index
    %c0_82 = arith.constant 0 : index
    %170 = vector.load %arg2[%c73, %c0_82] : memref<88x128xf32, #tpu.memory_space<vmem>>, vector<1x128xf32>
    tpu.vector_store %arg2[%c73, %c0_82], %168 {strides = array<i32>} : memref<88x128xf32, #tpu.memory_space<vmem>>, vector<1x128xf32>,
    %171 = arith.mulf %81, %71 : vector<16x128xf32>
    %cst_83 = arith.constant dense<0.000000e+00> : vector<128xf32>
    %172 = vector.multi_reduction <add>, %171, %cst_83 [0] : vector<16x128xf32> to vector<128xf32>
    %173 = vector.shape_cast %172 : vector<128xf32> to vector<1x128xf32>
    %c20 = arith.constant 20 : index
    %c0_84 = arith.constant 0 : index
    %174 = vector.load %arg2[%c20, %c0_84] : memref<88x128xf32, #tpu.memory_space<vmem>>, vector<1x128xf32>
    tpu.vector_store %arg2[%c20, %c0_84], %173 {strides = array<i32>} : memref<88x128xf32, #tpu.memory_space<vmem>>, vector<1x128xf32>,
    %175 = arith.mulf %81, %77 : vector<16x128xf32>
    %cst_85 = arith.constant dense<0.000000e+00> : vector<128xf32>
    %176 = vector.multi_reduction <add>, %175, %cst_85 [0] : vector<16x128xf32> to vector<128xf32>
    %177 = vector.shape_cast %176 : vector<128xf32> to vector<1x128xf32>
    %c21 = arith.constant 21 : index
    %c0_86 = arith.constant 0 : index
    %178 = vector.load %arg2[%c21, %c0_86] : memref<88x128xf32, #tpu.memory_space<vmem>>, vector<1x128xf32>
    tpu.vector_store %arg2[%c21, %c0_86], %177 {strides = array<i32>} : memref<88x128xf32, #tpu.memory_space<vmem>>, vector<1x128xf32>,
    %c29 = arith.constant 29 : index
    %c0_87 = arith.constant 0 : index
    %179 = vector.load %arg2[%c29, %c0_87] : memref<88x128xf32, #tpu.memory_space<vmem>>, vector<1x128xf32>
    tpu.vector_store %arg2[%c29, %c0_87], %177 {strides = array<i32>} : memref<88x128xf32, #tpu.memory_space<vmem>>, vector<1x128xf32>,
    %180 = arith.mulf %81, %78 : vector<16x128xf32>
    %cst_88 = arith.constant dense<0.000000e+00> : vector<128xf32>
    %181 = vector.multi_reduction <add>, %180, %cst_88 [0] : vector<16x128xf32> to vector<128xf32>
    %182 = vector.shape_cast %181 : vector<128xf32> to vector<1x128xf32>
    %c22 = arith.constant 22 : index
    %c0_89 = arith.constant 0 : index
    %183 = vector.load %arg2[%c22, %c0_89] : memref<88x128xf32, #tpu.memory_space<vmem>>, vector<1x128xf32>
    tpu.vector_store %arg2[%c22, %c0_89], %182 {strides = array<i32>} : memref<88x128xf32, #tpu.memory_space<vmem>>, vector<1x128xf32>,
    %c38 = arith.constant 38 : index
    %c0_90 = arith.constant 0 : index
    %184 = vector.load %arg2[%c38, %c0_90] : memref<88x128xf32, #tpu.memory_space<vmem>>, vector<1x128xf32>
    tpu.vector_store %arg2[%c38, %c0_90], %182 {strides = array<i32>} : memref<88x128xf32, #tpu.memory_space<vmem>>, vector<1x128xf32>,
    %185 = arith.mulf %81, %73 : vector<16x128xf32>
    %cst_91 = arith.constant dense<0.000000e+00> : vector<128xf32>
    %186 = vector.multi_reduction <add>, %185, %cst_91 [0] : vector<16x128xf32> to vector<128xf32>
    %187 = vector.shape_cast %186 : vector<128xf32> to vector<1x128xf32>
    %c23 = arith.constant 23 : index
    %c0_92 = arith.constant 0 : index
    %188 = vector.load %arg2[%c23, %c0_92] : memref<88x128xf32, #tpu.memory_space<vmem>>, vector<1x128xf32>
    tpu.vector_store %arg2[%c23, %c0_92], %187 {strides = array<i32>} : memref<88x128xf32, #tpu.memory_space<vmem>>, vector<1x128xf32>,
    %c47 = arith.constant 47 : index
    %c0_93 = arith.constant 0 : index
    %189 = vector.load %arg2[%c47, %c0_93] : memref<88x128xf32, #tpu.memory_space<vmem>>, vector<1x128xf32>
    tpu.vector_store %arg2[%c47, %c0_93], %187 {strides = array<i32>} : memref<88x128xf32, #tpu.memory_space<vmem>>, vector<1x128xf32>,
    %190 = arith.mulf %81, %67 : vector<16x128xf32>
    %cst_94 = arith.constant dense<0.000000e+00> : vector<128xf32>
    %191 = vector.multi_reduction <add>, %190, %cst_94 [0] : vector<16x128xf32> to vector<128xf32>
    %192 = vector.shape_cast %191 : vector<128xf32> to vector<1x128xf32>
    %c24 = arith.constant 24 : index
    %c0_95 = arith.constant 0 : index
    %193 = vector.load %arg2[%c24, %c0_95] : memref<88x128xf32, #tpu.memory_space<vmem>>, vector<1x128xf32>
    tpu.vector_store %arg2[%c24, %c0_95], %192 {strides = array<i32>} : memref<88x128xf32, #tpu.memory_space<vmem>>, vector<1x128xf32>,
    %c56 = arith.constant 56 : index
    %c0_96 = arith.constant 0 : index
    %194 = vector.load %arg2[%c56, %c0_96] : memref<88x128xf32, #tpu.memory_space<vmem>>, vector<1x128xf32>
    tpu.vector_store %arg2[%c56, %c0_96], %192 {strides = array<i32>} : memref<88x128xf32, #tpu.memory_space<vmem>>, vector<1x128xf32>,
    %195 = arith.mulf %81, %69 : vector<16x128xf32>
    %cst_97 = arith.constant dense<0.000000e+00> : vector<128xf32>
    %196 = vector.multi_reduction <add>, %195, %cst_97 [0] : vector<16x128xf32> to vector<128xf32>
    %197 = vector.shape_cast %196 : vector<128xf32> to vector<1x128xf32>
    %c25 = arith.constant 25 : index
    %c0_98 = arith.constant 0 : index
    %198 = vector.load %arg2[%c25, %c0_98] : memref<88x128xf32, #tpu.memory_space<vmem>>, vector<1x128xf32>
    tpu.vector_store %arg2[%c25, %c0_98], %197 {strides = array<i32>} : memref<88x128xf32, #tpu.memory_space<vmem>>, vector<1x128xf32>,
    %c65 = arith.constant 65 : index
    %c0_99 = arith.constant 0 : index
    %199 = vector.load %arg2[%c65, %c0_99] : memref<88x128xf32, #tpu.memory_space<vmem>>, vector<1x128xf32>
    tpu.vector_store %arg2[%c65, %c0_99], %197 {strides = array<i32>} : memref<88x128xf32, #tpu.memory_space<vmem>>, vector<1x128xf32>,
    %200 = arith.mulf %81, %74 : vector<16x128xf32>
    %cst_100 = arith.constant dense<0.000000e+00> : vector<128xf32>
    %201 = vector.multi_reduction <add>, %200, %cst_100 [0] : vector<16x128xf32> to vector<128xf32>
    %202 = vector.shape_cast %201 : vector<128xf32> to vector<1x128xf32>
    %c26 = arith.constant 26 : index
    %c0_101 = arith.constant 0 : index
    %203 = vector.load %arg2[%c26, %c0_101] : memref<88x128xf32, #tpu.memory_space<vmem>>, vector<1x128xf32>
    tpu.vector_store %arg2[%c26, %c0_101], %202 {strides = array<i32>} : memref<88x128xf32, #tpu.memory_space<vmem>>, vector<1x128xf32>,
    %c74 = arith.constant 74 : index
    %c0_102 = arith.constant 0 : index
    %204 = vector.load %arg2[%c74, %c0_102] : memref<88x128xf32, #tpu.memory_space<vmem>>, vector<1x128xf32>
    tpu.vector_store %arg2[%c74, %c0_102], %202 {strides = array<i32>} : memref<88x128xf32, #tpu.memory_space<vmem>>, vector<1x128xf32>,
    %205 = arith.mulf %82, %77 : vector<16x128xf32>
    %cst_103 = arith.constant dense<0.000000e+00> : vector<128xf32>
    %206 = vector.multi_reduction <add>, %205, %cst_103 [0] : vector<16x128xf32> to vector<128xf32>
    %207 = vector.shape_cast %206 : vector<128xf32> to vector<1x128xf32>
    %c30 = arith.constant 30 : index
    %c0_104 = arith.constant 0 : index
    %208 = vector.load %arg2[%c30, %c0_104] : memref<88x128xf32, #tpu.memory_space<vmem>>, vector<1x128xf32>
    tpu.vector_store %arg2[%c30, %c0_104], %207 {strides = array<i32>} : memref<88x128xf32, #tpu.memory_space<vmem>>, vector<1x128xf32>,
    %209 = arith.mulf %82, %78 : vector<16x128xf32>
    %cst_105 = arith.constant dense<0.000000e+00> : vector<128xf32>
    %210 = vector.multi_reduction <add>, %209, %cst_105 [0] : vector<16x128xf32> to vector<128xf32>
    %211 = vector.shape_cast %210 : vector<128xf32> to vector<1x128xf32>
    %c31 = arith.constant 31 : index
    %c0_106 = arith.constant 0 : index
    %212 = vector.load %arg2[%c31, %c0_106] : memref<88x128xf32, #tpu.memory_space<vmem>>, vector<1x128xf32>
    tpu.vector_store %arg2[%c31, %c0_106], %211 {strides = array<i32>} : memref<88x128xf32, #tpu.memory_space<vmem>>, vector<1x128xf32>,
    %c39 = arith.constant 39 : index
    %c0_107 = arith.constant 0 : index
    %213 = vector.load %arg2[%c39, %c0_107] : memref<88x128xf32, #tpu.memory_space<vmem>>, vector<1x128xf32>
    tpu.vector_store %arg2[%c39, %c0_107], %211 {strides = array<i32>} : memref<88x128xf32, #tpu.memory_space<vmem>>, vector<1x128xf32>,
    %214 = arith.mulf %82, %73 : vector<16x128xf32>
    %cst_108 = arith.constant dense<0.000000e+00> : vector<128xf32>
    %215 = vector.multi_reduction <add>, %214, %cst_108 [0] : vector<16x128xf32> to vector<128xf32>
    %216 = vector.shape_cast %215 : vector<128xf32> to vector<1x128xf32>
    %c32 = arith.constant 32 : index
    %c0_109 = arith.constant 0 : index
    %217 = vector.load %arg2[%c32, %c0_109] : memref<88x128xf32, #tpu.memory_space<vmem>>, vector<1x128xf32>
    tpu.vector_store %arg2[%c32, %c0_109], %216 {strides = array<i32>} : memref<88x128xf32, #tpu.memory_space<vmem>>, vector<1x128xf32>,
    %c48 = arith.constant 48 : index
    %c0_110 = arith.constant 0 : index
    %218 = vector.load %arg2[%c48, %c0_110] : memref<88x128xf32, #tpu.memory_space<vmem>>, vector<1x128xf32>
    tpu.vector_store %arg2[%c48, %c0_110], %216 {strides = array<i32>} : memref<88x128xf32, #tpu.memory_space<vmem>>, vector<1x128xf32>,
    %219 = arith.mulf %82, %67 : vector<16x128xf32>
    %cst_111 = arith.constant dense<0.000000e+00> : vector<128xf32>
    %220 = vector.multi_reduction <add>, %219, %cst_111 [0] : vector<16x128xf32> to vector<128xf32>
    %221 = vector.shape_cast %220 : vector<128xf32> to vector<1x128xf32>
    %c33 = arith.constant 33 : index
    %c0_112 = arith.constant 0 : index
    %222 = vector.load %arg2[%c33, %c0_112] : memref<88x128xf32, #tpu.memory_space<vmem>>, vector<1x128xf32>
    tpu.vector_store %arg2[%c33, %c0_112], %221 {strides = array<i32>} : memref<88x128xf32, #tpu.memory_space<vmem>>, vector<1x128xf32>,
    %c57 = arith.constant 57 : index
    %c0_113 = arith.constant 0 : index
    %223 = vector.load %arg2[%c57, %c0_113] : memref<88x128xf32, #tpu.memory_space<vmem>>, vector<1x128xf32>
    tpu.vector_store %arg2[%c57, %c0_113], %221 {strides = array<i32>} : memref<88x128xf32, #tpu.memory_space<vmem>>, vector<1x128xf32>,
    %224 = arith.mulf %82, %69 : vector<16x128xf32>
    %cst_114 = arith.constant dense<0.000000e+00> : vector<128xf32>
    %225 = vector.multi_reduction <add>, %224, %cst_114 [0] : vector<16x128xf32> to vector<128xf32>
    %226 = vector.shape_cast %225 : vector<128xf32> to vector<1x128xf32>
    %c34 = arith.constant 34 : index
    %c0_115 = arith.constant 0 : index
    %227 = vector.load %arg2[%c34, %c0_115] : memref<88x128xf32, #tpu.memory_space<vmem>>, vector<1x128xf32>
    tpu.vector_store %arg2[%c34, %c0_115], %226 {strides = array<i32>} : memref<88x128xf32, #tpu.memory_space<vmem>>, vector<1x128xf32>,
    %c66 = arith.constant 66 : index
    %c0_116 = arith.constant 0 : index
    %228 = vector.load %arg2[%c66, %c0_116] : memref<88x128xf32, #tpu.memory_space<vmem>>, vector<1x128xf32>
    tpu.vector_store %arg2[%c66, %c0_116], %226 {strides = array<i32>} : memref<88x128xf32, #tpu.memory_space<vmem>>, vector<1x128xf32>,
    %229 = arith.mulf %82, %74 : vector<16x128xf32>
    %cst_117 = arith.constant dense<0.000000e+00> : vector<128xf32>
    %230 = vector.multi_reduction <add>, %229, %cst_117 [0] : vector<16x128xf32> to vector<128xf32>
    %231 = vector.shape_cast %230 : vector<128xf32> to vector<1x128xf32>
    %c35 = arith.constant 35 : index
    %c0_118 = arith.constant 0 : index
    %232 = vector.load %arg2[%c35, %c0_118] : memref<88x128xf32, #tpu.memory_space<vmem>>, vector<1x128xf32>
    tpu.vector_store %arg2[%c35, %c0_118], %231 {strides = array<i32>} : memref<88x128xf32, #tpu.memory_space<vmem>>, vector<1x128xf32>,
    %c75 = arith.constant 75 : index
    %c0_119 = arith.constant 0 : index
    %233 = vector.load %arg2[%c75, %c0_119] : memref<88x128xf32, #tpu.memory_space<vmem>>, vector<1x128xf32>
    tpu.vector_store %arg2[%c75, %c0_119], %231 {strides = array<i32>} : memref<88x128xf32, #tpu.memory_space<vmem>>, vector<1x128xf32>,
    %234 = arith.mulf %83, %78 : vector<16x128xf32>
    %cst_120 = arith.constant dense<0.000000e+00> : vector<128xf32>
    %235 = vector.multi_reduction <add>, %234, %cst_120 [0] : vector<16x128xf32> to vector<128xf32>
    %236 = vector.shape_cast %235 : vector<128xf32> to vector<1x128xf32>
    %c40 = arith.constant 40 : index
    %c0_121 = arith.constant 0 : index
    %237 = vector.load %arg2[%c40, %c0_121] : memref<88x128xf32, #tpu.memory_space<vmem>>, vector<1x128xf32>
    tpu.vector_store %arg2[%c40, %c0_121], %236 {strides = array<i32>} : memref<88x128xf32, #tpu.memory_space<vmem>>, vector<1x128xf32>,
    %238 = arith.mulf %83, %73 : vector<16x128xf32>
    %cst_122 = arith.constant dense<0.000000e+00> : vector<128xf32>
    %239 = vector.multi_reduction <add>, %238, %cst_122 [0] : vector<16x128xf32> to vector<128xf32>
    %240 = vector.shape_cast %239 : vector<128xf32> to vector<1x128xf32>
    %c41 = arith.constant 41 : index
    %c0_123 = arith.constant 0 : index
    %241 = vector.load %arg2[%c41, %c0_123] : memref<88x128xf32, #tpu.memory_space<vmem>>, vector<1x128xf32>
    tpu.vector_store %arg2[%c41, %c0_123], %240 {strides = array<i32>} : memref<88x128xf32, #tpu.memory_space<vmem>>, vector<1x128xf32>,
    %c49 = arith.constant 49 : index
    %c0_124 = arith.constant 0 : index
    %242 = vector.load %arg2[%c49, %c0_124] : memref<88x128xf32, #tpu.memory_space<vmem>>, vector<1x128xf32>
    tpu.vector_store %arg2[%c49, %c0_124], %240 {strides = array<i32>} : memref<88x128xf32, #tpu.memory_space<vmem>>, vector<1x128xf32>,
    %243 = arith.mulf %83, %67 : vector<16x128xf32>
    %cst_125 = arith.constant dense<0.000000e+00> : vector<128xf32>
    %244 = vector.multi_reduction <add>, %243, %cst_125 [0] : vector<16x128xf32> to vector<128xf32>
    %245 = vector.shape_cast %244 : vector<128xf32> to vector<1x128xf32>
    %c42 = arith.constant 42 : index
    %c0_126 = arith.constant 0 : index
    %246 = vector.load %arg2[%c42, %c0_126] : memref<88x128xf32, #tpu.memory_space<vmem>>, vector<1x128xf32>
    tpu.vector_store %arg2[%c42, %c0_126], %245 {strides = array<i32>} : memref<88x128xf32, #tpu.memory_space<vmem>>, vector<1x128xf32>,
    %c58 = arith.constant 58 : index
    %c0_127 = arith.constant 0 : index
    %247 = vector.load %arg2[%c58, %c0_127] : memref<88x128xf32, #tpu.memory_space<vmem>>, vector<1x128xf32>
    tpu.vector_store %arg2[%c58, %c0_127], %245 {strides = array<i32>} : memref<88x128xf32, #tpu.memory_space<vmem>>, vector<1x128xf32>,
    %248 = arith.mulf %83, %69 : vector<16x128xf32>
    %cst_128 = arith.constant dense<0.000000e+00> : vector<128xf32>
    %249 = vector.multi_reduction <add>, %248, %cst_128 [0] : vector<16x128xf32> to vector<128xf32>
    %250 = vector.shape_cast %249 : vector<128xf32> to vector<1x128xf32>
    %c43 = arith.constant 43 : index
    %c0_129 = arith.constant 0 : index
    %251 = vector.load %arg2[%c43, %c0_129] : memref<88x128xf32, #tpu.memory_space<vmem>>, vector<1x128xf32>
    tpu.vector_store %arg2[%c43, %c0_129], %250 {strides = array<i32>} : memref<88x128xf32, #tpu.memory_space<vmem>>, vector<1x128xf32>,
    %c67 = arith.constant 67 : index
    %c0_130 = arith.constant 0 : index
    %252 = vector.load %arg2[%c67, %c0_130] : memref<88x128xf32, #tpu.memory_space<vmem>>, vector<1x128xf32>
    tpu.vector_store %arg2[%c67, %c0_130], %250 {strides = array<i32>} : memref<88x128xf32, #tpu.memory_space<vmem>>, vector<1x128xf32>,
    %253 = arith.mulf %83, %74 : vector<16x128xf32>
    %cst_131 = arith.constant dense<0.000000e+00> : vector<128xf32>
    %254 = vector.multi_reduction <add>, %253, %cst_131 [0] : vector<16x128xf32> to vector<128xf32>
    %255 = vector.shape_cast %254 : vector<128xf32> to vector<1x128xf32>
    %c44 = arith.constant 44 : index
    %c0_132 = arith.constant 0 : index
    %256 = vector.load %arg2[%c44, %c0_132] : memref<88x128xf32, #tpu.memory_space<vmem>>, vector<1x128xf32>
    tpu.vector_store %arg2[%c44, %c0_132], %255 {strides = array<i32>} : memref<88x128xf32, #tpu.memory_space<vmem>>, vector<1x128xf32>,
    %c76 = arith.constant 76 : index
    %c0_133 = arith.constant 0 : index
    %257 = vector.load %arg2[%c76, %c0_133] : memref<88x128xf32, #tpu.memory_space<vmem>>, vector<1x128xf32>
    tpu.vector_store %arg2[%c76, %c0_133], %255 {strides = array<i32>} : memref<88x128xf32, #tpu.memory_space<vmem>>, vector<1x128xf32>,
    %258 = arith.mulf %84, %73 : vector<16x128xf32>
    %cst_134 = arith.constant dense<0.000000e+00> : vector<128xf32>
    %259 = vector.multi_reduction <add>, %258, %cst_134 [0] : vector<16x128xf32> to vector<128xf32>
    %260 = vector.shape_cast %259 : vector<128xf32> to vector<1x128xf32>
    %c50 = arith.constant 50 : index
    %c0_135 = arith.constant 0 : index
    %261 = vector.load %arg2[%c50, %c0_135] : memref<88x128xf32, #tpu.memory_space<vmem>>, vector<1x128xf32>
    tpu.vector_store %arg2[%c50, %c0_135], %260 {strides = array<i32>} : memref<88x128xf32, #tpu.memory_space<vmem>>, vector<1x128xf32>,
    %262 = arith.mulf %84, %67 : vector<16x128xf32>
    %cst_136 = arith.constant dense<0.000000e+00> : vector<128xf32>
    %263 = vector.multi_reduction <add>, %262, %cst_136 [0] : vector<16x128xf32> to vector<128xf32>
    %264 = vector.shape_cast %263 : vector<128xf32> to vector<1x128xf32>
    %c51 = arith.constant 51 : index
    %c0_137 = arith.constant 0 : index
    %265 = vector.load %arg2[%c51, %c0_137] : memref<88x128xf32, #tpu.memory_space<vmem>>, vector<1x128xf32>
    tpu.vector_store %arg2[%c51, %c0_137], %264 {strides = array<i32>} : memref<88x128xf32, #tpu.memory_space<vmem>>, vector<1x128xf32>,
    %c59 = arith.constant 59 : index
    %c0_138 = arith.constant 0 : index
    %266 = vector.load %arg2[%c59, %c0_138] : memref<88x128xf32, #tpu.memory_space<vmem>>, vector<1x128xf32>
    tpu.vector_store %arg2[%c59, %c0_138], %264 {strides = array<i32>} : memref<88x128xf32, #tpu.memory_space<vmem>>, vector<1x128xf32>,
    %267 = arith.mulf %84, %69 : vector<16x128xf32>
    %cst_139 = arith.constant dense<0.000000e+00> : vector<128xf32>
    %268 = vector.multi_reduction <add>, %267, %cst_139 [0] : vector<16x128xf32> to vector<128xf32>
    %269 = vector.shape_cast %268 : vector<128xf32> to vector<1x128xf32>
    %c52 = arith.constant 52 : index
    %c0_140 = arith.constant 0 : index
    %270 = vector.load %arg2[%c52, %c0_140] : memref<88x128xf32, #tpu.memory_space<vmem>>, vector<1x128xf32>
    tpu.vector_store %arg2[%c52, %c0_140], %269 {strides = array<i32>} : memref<88x128xf32, #tpu.memory_space<vmem>>, vector<1x128xf32>,
    %c68 = arith.constant 68 : index
    %c0_141 = arith.constant 0 : index
    %271 = vector.load %arg2[%c68, %c0_141] : memref<88x128xf32, #tpu.memory_space<vmem>>, vector<1x128xf32>
    tpu.vector_store %arg2[%c68, %c0_141], %269 {strides = array<i32>} : memref<88x128xf32, #tpu.memory_space<vmem>>, vector<1x128xf32>,
    %272 = arith.mulf %84, %74 : vector<16x128xf32>
    %cst_142 = arith.constant dense<0.000000e+00> : vector<128xf32>
    %273 = vector.multi_reduction <add>, %272, %cst_142 [0] : vector<16x128xf32> to vector<128xf32>
    %274 = vector.shape_cast %273 : vector<128xf32> to vector<1x128xf32>
    %c53 = arith.constant 53 : index
    %c0_143 = arith.constant 0 : index
    %275 = vector.load %arg2[%c53, %c0_143] : memref<88x128xf32, #tpu.memory_space<vmem>>, vector<1x128xf32>
    tpu.vector_store %arg2[%c53, %c0_143], %274 {strides = array<i32>} : memref<88x128xf32, #tpu.memory_space<vmem>>, vector<1x128xf32>,
    %c77 = arith.constant 77 : index
    %c0_144 = arith.constant 0 : index
    %276 = vector.load %arg2[%c77, %c0_144] : memref<88x128xf32, #tpu.memory_space<vmem>>, vector<1x128xf32>
    tpu.vector_store %arg2[%c77, %c0_144], %274 {strides = array<i32>} : memref<88x128xf32, #tpu.memory_space<vmem>>, vector<1x128xf32>,
    %277 = arith.mulf %85, %67 : vector<16x128xf32>
    %cst_145 = arith.constant dense<0.000000e+00> : vector<128xf32>
    %278 = vector.multi_reduction <add>, %277, %cst_145 [0] : vector<16x128xf32> to vector<128xf32>
    %279 = vector.shape_cast %278 : vector<128xf32> to vector<1x128xf32>
    %c60 = arith.constant 60 : index
    %c0_146 = arith.constant 0 : index
    %280 = vector.load %arg2[%c60, %c0_146] : memref<88x128xf32, #tpu.memory_space<vmem>>, vector<1x128xf32>
    tpu.vector_store %arg2[%c60, %c0_146], %279 {strides = array<i32>} : memref<88x128xf32, #tpu.memory_space<vmem>>, vector<1x128xf32>,
    %281 = arith.mulf %85, %69 : vector<16x128xf32>
    %cst_147 = arith.constant dense<0.000000e+00> : vector<128xf32>
    %282 = vector.multi_reduction <add>, %281, %cst_147 [0] : vector<16x128xf32> to vector<128xf32>
    %283 = vector.shape_cast %282 : vector<128xf32> to vector<1x128xf32>
    %c61 = arith.constant 61 : index
    %c0_148 = arith.constant 0 : index
    %284 = vector.load %arg2[%c61, %c0_148] : memref<88x128xf32, #tpu.memory_space<vmem>>, vector<1x128xf32>
    tpu.vector_store %arg2[%c61, %c0_148], %283 {strides = array<i32>} : memref<88x128xf32, #tpu.memory_space<vmem>>, vector<1x128xf32>,
    %c69 = arith.constant 69 : index
    %c0_149 = arith.constant 0 : index
    %285 = vector.load %arg2[%c69, %c0_149] : memref<88x128xf32, #tpu.memory_space<vmem>>, vector<1x128xf32>
    tpu.vector_store %arg2[%c69, %c0_149], %283 {strides = array<i32>} : memref<88x128xf32, #tpu.memory_space<vmem>>, vector<1x128xf32>,
    %286 = arith.mulf %85, %74 : vector<16x128xf32>
    %cst_150 = arith.constant dense<0.000000e+00> : vector<128xf32>
    %287 = vector.multi_reduction <add>, %286, %cst_150 [0] : vector<16x128xf32> to vector<128xf32>
    %288 = vector.shape_cast %287 : vector<128xf32> to vector<1x128xf32>
    %c62 = arith.constant 62 : index
    %c0_151 = arith.constant 0 : index
    %289 = vector.load %arg2[%c62, %c0_151] : memref<88x128xf32, #tpu.memory_space<vmem>>, vector<1x128xf32>
    tpu.vector_store %arg2[%c62, %c0_151], %288 {strides = array<i32>} : memref<88x128xf32, #tpu.memory_space<vmem>>, vector<1x128xf32>,
    %c78 = arith.constant 78 : index
    %c0_152 = arith.constant 0 : index
    %290 = vector.load %arg2[%c78, %c0_152] : memref<88x128xf32, #tpu.memory_space<vmem>>, vector<1x128xf32>
    tpu.vector_store %arg2[%c78, %c0_152], %288 {strides = array<i32>} : memref<88x128xf32, #tpu.memory_space<vmem>>, vector<1x128xf32>,
    %291 = arith.mulf %86, %69 : vector<16x128xf32>
    %cst_153 = arith.constant dense<0.000000e+00> : vector<128xf32>
    %292 = vector.multi_reduction <add>, %291, %cst_153 [0] : vector<16x128xf32> to vector<128xf32>
    %293 = vector.shape_cast %292 : vector<128xf32> to vector<1x128xf32>
    %c70 = arith.constant 70 : index
    %c0_154 = arith.constant 0 : index
    %294 = vector.load %arg2[%c70, %c0_154] : memref<88x128xf32, #tpu.memory_space<vmem>>, vector<1x128xf32>
    tpu.vector_store %arg2[%c70, %c0_154], %293 {strides = array<i32>} : memref<88x128xf32, #tpu.memory_space<vmem>>, vector<1x128xf32>,
    %295 = arith.mulf %86, %74 : vector<16x128xf32>
    %cst_155 = arith.constant dense<0.000000e+00> : vector<128xf32>
    %296 = vector.multi_reduction <add>, %295, %cst_155 [0] : vector<16x128xf32> to vector<128xf32>
    %297 = vector.shape_cast %296 : vector<128xf32> to vector<1x128xf32>
    %c71 = arith.constant 71 : index
    %c0_156 = arith.constant 0 : index
    %298 = vector.load %arg2[%c71, %c0_156] : memref<88x128xf32, #tpu.memory_space<vmem>>, vector<1x128xf32>
    tpu.vector_store %arg2[%c71, %c0_156], %297 {strides = array<i32>} : memref<88x128xf32, #tpu.memory_space<vmem>>, vector<1x128xf32>,
    %c79 = arith.constant 79 : index
    %c0_157 = arith.constant 0 : index
    %299 = vector.load %arg2[%c79, %c0_157] : memref<88x128xf32, #tpu.memory_space<vmem>>, vector<1x128xf32>
    tpu.vector_store %arg2[%c79, %c0_157], %297 {strides = array<i32>} : memref<88x128xf32, #tpu.memory_space<vmem>>, vector<1x128xf32>,
    %300 = arith.mulf %87, %74 : vector<16x128xf32>
    %cst_158 = arith.constant dense<0.000000e+00> : vector<128xf32>
    %301 = vector.multi_reduction <add>, %300, %cst_158 [0] : vector<16x128xf32> to vector<128xf32>
    %302 = vector.shape_cast %301 : vector<128xf32> to vector<1x128xf32>
    %c80 = arith.constant 80 : index
    %c0_159 = arith.constant 0 : index
    %303 = vector.load %arg2[%c80, %c0_159] : memref<88x128xf32, #tpu.memory_space<vmem>>, vector<1x128xf32>
    tpu.vector_store %arg2[%c80, %c0_159], %302 {strides = array<i32>} : memref<88x128xf32, #tpu.memory_space<vmem>>, vector<1x128xf32>,
    %c81 = arith.constant 81 : index
    %c0_160 = arith.constant 0 : index
    %304 = vector.load %arg2[%c81, %c0_160] : memref<88x128xf32, #tpu.memory_space<vmem>>, vector<1x128xf32>
    tpu.vector_store %arg2[%c81, %c0_160], %16 {strides = array<i32>} : memref<88x128xf32, #tpu.memory_space<vmem>>, vector<1x128xf32>,
    %c82 = arith.constant 82 : index
    %c0_161 = arith.constant 0 : index
    %305 = vector.load %arg2[%c82, %c0_161] : memref<88x128xf32, #tpu.memory_space<vmem>>, vector<1x128xf32>
    tpu.vector_store %arg2[%c82, %c0_161], %21 {strides = array<i32>} : memref<88x128xf32, #tpu.memory_space<vmem>>, vector<1x128xf32>,
    %c83 = arith.constant 83 : index
    %c0_162 = arith.constant 0 : index
    %306 = vector.load %arg2[%c83, %c0_162] : memref<88x128xf32, #tpu.memory_space<vmem>>, vector<1x128xf32>
    tpu.vector_store %arg2[%c83, %c0_162], %61 {strides = array<i32>} : memref<88x128xf32, #tpu.memory_space<vmem>>, vector<1x128xf32>,
    %c84 = arith.constant 84 : index
    %c0_163 = arith.constant 0 : index
    %307 = vector.load %arg2[%c84, %c0_163] : memref<88x128xf32, #tpu.memory_space<vmem>>, vector<1x128xf32>
    tpu.vector_store %arg2[%c84, %c0_163], %26 {strides = array<i32>} : memref<88x128xf32, #tpu.memory_space<vmem>>, vector<1x128xf32>,
    %c85 = arith.constant 85 : index
    %c0_164 = arith.constant 0 : index
    %308 = vector.load %arg2[%c85, %c0_164] : memref<88x128xf32, #tpu.memory_space<vmem>>, vector<1x128xf32>
    tpu.vector_store %arg2[%c85, %c0_164], %31 {strides = array<i32>} : memref<88x128xf32, #tpu.memory_space<vmem>>, vector<1x128xf32>,
    %c86 = arith.constant 86 : index
    %c0_165 = arith.constant 0 : index
    %309 = vector.load %arg2[%c86, %c0_165] : memref<88x128xf32, #tpu.memory_space<vmem>>, vector<1x128xf32>
    tpu.vector_store %arg2[%c86, %c0_165], %65 {strides = array<i32>} : memref<88x128xf32, #tpu.memory_space<vmem>>, vector<1x128xf32>,
    %cst_166 = arith.constant 0.000000e+00 : f32
    %310 = vector.broadcast %cst_166 : f32 to vector<1x128xf32>
    %c87 = arith.constant 87 : index
    %c0_167 = arith.constant 0 : index
    %311 = vector.load %arg2[%c87, %c0_167] : memref<88x128xf32, #tpu.memory_space<vmem>>, vector<1x128xf32>
    tpu.vector_store %arg2[%c87, %c0_167], %310 {strides = array<i32>} : memref<88x128xf32, #tpu.memory_space<vmem>>, vector<1x128xf32>,
    return
  }
  func.func @transform_0(%arg0: i32) -> (i32, i32, i32) {
    %c0_i32 = arith.constant 0 : i32
    %c0_i32_0 = arith.constant 0 : i32
    %c0_i32_1 = arith.constant 0 : i32
    return %c0_i32, %c0_i32_0, %arg0 : i32, i32, i32
  }
  func.func @transform_1(%arg0: i32) -> (i32, i32) {
    %c0_i32 = arith.constant 0 : i32
    %c0_i32_0 = arith.constant 0 : i32
    return %c0_i32, %arg0 : i32, i32
  }
}

</mosaic_0001>

<bundles_post_ra>
// kernel: tpu_custom_call.1
= control target key start
LH: loop header
LB: loop body
LE: loop exit
PB: predicated region body
PF: predicated region fallthrough
CT: control target
= control target key end

     0   :  { %6 = vsyncpa [#allocation3], 0  ;;  %s1090_s0 = inlined_call_operand.hbm [shape: f32[8,16,128], index: 0, kind: input, shape index: {}]   ;;  %s1091_s1 = inlined_call_operand.hbm [shape: f32[88,128], index: 1, kind: output, shape index: {}]  }
   0x1   :  { %7 = vsyncpa [#allocation4], 0  ;;  %s743_s6 = smov [#allocation2]   ;;  %s695_s10 = scalar_lea.hbm %s1090_s0, 2048 }
   0x2   :  { %s13_s7 = sshll.u32 %s743_s6, 4  ;;  %p696_p0 = scmp.ne.s32.totalorder %s1090_s0, %s695_s10  ;;  %s14_s7 = int_to_ptr.vmem [resolvable:$true] %s13_s7 }
   0x3   :  { %p699_p1 = scmp.lt.u32.totalorder %s695_s10, %s1090_s0 }
   0x5   :  { %p701_p2 = pnand %p699_p1, %p696_p0 }
   0x7   :  { %704 = shalt.err (!%p701_p2)
}
   0x8   :  { %s705_s15 = scalar_lea.vmem %s14_s7, 2048  ;;  %p710_p4 = scmp.lt.s32.totalorder %s14_s7, %s14_s7 }
   0x9   :  { %p706_p3 = scmp.ne.s32.totalorder %s14_s7, %s705_s15  ;;  %p711_p5 = scmp.lt.s32.totalorder %s705_s15, %s705_s15 }
   0xb   :  { %p712_p6 = por %p711_p5, %p710_p4 }
   0xd   :  { %p713_p7 = pnand %p712_p6, %p706_p3 }
   0xf   :  { %716 = shalt.err (!%p713_p7)
}
  0x10   :  { %s744_s16 = smov 128   ;;  %s745_s17 = smov 8  }
  0x11   :  { %19 = dma.hbm_to_vmem [thread:$0]  %s1090_s0, 2048, %s14_s7, [#allocation3], %s744_s16, %s744_s16, %s745_s17  }
  0x12   :  { %739 = dma.done.wait [#allocation3], 2048  }
  0x13   :  { %740 = vsyncadd [#allocation3], 4294965248  ;;  %v23_v0 = vld [vmem:[#allocation2] sm:$0xff]  ;;  %v24_v1 = vld [vmem:[#allocation2 + $0x8] sm:$0xff]  ;;  %s747_s0 = smov [#allocation5]  }
  0x14   :  { %v26_v2 = vld [vmem:[#allocation2 + $0x10] sm:$0xff]  ;;  %v27_v3 = vld [vmem:[#allocation2 + $0x18] sm:$0xff]  ;;  %v29_v4 = vld [vmem:[#allocation2 + $0x20] sm:$0xff]  ;;  %s666_s20 = sshll.u32 %s747_s0, 4  ;;  %s667_s20 = int_to_ptr.vmem [resolvable:$true] %s666_s20 }
  0x15   :  { %v30_v5 = vld [vmem:[#allocation2 + $0x28] sm:$0xff]  ;;  %v32_v6 = vld [vmem:[#allocation2 + $0x30] sm:$0xff]  ;;  %v33_v7 = vld [vmem:[#allocation2 + $0x38] sm:$0xff]  ;;  %s717_s21 = scalar_lea.vmem %s667_s20, 1408  ;;  %p722_p9 = scmp.lt.s32.totalorder %s667_s20, %s667_s20 }
  0x16   :  { %v773_v8 = vld [vmem:[#allocation2 + $0x50] sm:$0xff]  ;;  %v775_v9 = vld [vmem:[#allocation2 + $0x58] sm:$0xff]  ;;  %p718_p8 = scmp.ne.s32.totalorder %s667_s20, %s717_s21  ;;  %p723_p10 = scmp.lt.s32.totalorder %s717_s21, %s717_s21 }
  0x17   :  { %v40_v10 = vmul.f32 %v773_v8, %v23_v0  ;;  %v41_v11 = vmul.f32 %v775_v9, %v24_v1  ;;  %v50_v12 = vmul.f32 %v773_v8, %v26_v2  ;;  %v51_v13 = vmul.f32 %v775_v9, %v27_v3 }
  0x18   :  { %v60_v14 = vmul.f32 %v773_v8, %v29_v4  ;;  %v61_v15 = vmul.f32 %v775_v9, %v30_v5  ;;  %v70_v16 = vmul.f32 %v773_v8, %v32_v6  ;;  %v71_v17 = vmul.f32 %v775_v9, %v33_v7  ;;  %p724_p11 = por %p723_p10, %p722_p9 }
  0x19   :  { %v42_v18 = vadd.f32 %v41_v11, %v40_v10  ;;  %v52_v19 = vadd.f32 %v51_v13, %v50_v12 }
  0x1a   :  { %v62_v20 = vadd.f32 %v61_v15, %v60_v14  ;;  %v72_v21 = vadd.f32 %v71_v17, %v70_v16  ;;  %p725_p12 = pnand %p724_p11, %p718_p8 }
  0x1b   :  { %v43_v22 = vrot.slane %v42_v18, 4  ;;  %v53_v23 = vrot.slane %v52_v19, 4 }
  0x1c   :  { %v63_v24 = vrot.slane %v62_v20, 4  ;;  %v73_v25 = vrot.slane %v72_v21, 4 }
  0x1d   :  { %v44_v26 = vadd.f32 %v43_v22, %v42_v18  ;;  %v54_v27 = vadd.f32 %v53_v23, %v52_v19 }
  0x1e   :  { %v64_v28 = vadd.f32 %v63_v24, %v62_v20  ;;  %v74_v29 = vadd.f32 %v73_v25, %v72_v21 }
  0x1f   :  { %v45_v30 = vrot.slane %v44_v26, 2  ;;  %v55_v31 = vrot.slane %v54_v27, 2 }
  0x20   :  { %v65_v32 = vrot.slane %v64_v28, 2  ;;  %v75_v33 = vrot.slane %v74_v29, 2 }
  0x21   :  { %v46_v34 = vadd.f32 %v45_v30, %v44_v26  ;;  %v56_v35 = vadd.f32 %v55_v31, %v54_v27  ;;  %v823_v30 = vld [vmem:[#allocation2 + $0x48] sm:$0xff] }
  0x22   :  { %v66_v36 = vadd.f32 %v65_v32, %v64_v28  ;;  %v76_v37 = vadd.f32 %v75_v33, %v74_v29  ;;  %v821_v29 = vld [vmem:[#allocation2 + $0x40] sm:$0xff] }
  0x23   :  { %v47_v38 = vrot.slane %v46_v34, 1  ;;  %v57_v39 = vrot.slane %v56_v35, 1 }
  0x24   :  { %v67_v40 = vrot.slane %v66_v36, 1  ;;  %v77_v41 = vrot.slane %v76_v37, 1 }
  0x25   :  { %v48_v42 = vadd.f32 %v47_v38, %v46_v34  ;;  %v58_v43 = vadd.f32 %v57_v39, %v56_v35  ;;  %v646_v35 = vadd.f32 %v823_v30, %v821_v29 }
  0x26   :  { %v68_v44 = vadd.f32 %v67_v40, %v66_v36  ;;  %v78_v45 = vadd.f32 %v77_v41, %v76_v37 }
  0x27   :  { %v49_v46 = vmul.f32 0.0625, %v48_v42  ;;  %v59_v47 = vmul.f32 0.0625, %v58_v43  ;;  %v647_v38 = vrot.slane %v646_v35, 4 }
  0x28   :  { %v69_v48 = vmul.f32 0.0625, %v68_v44  ;;  %v79_v49 = vmul.f32 0.0625, %v78_v45 }
  0x29   :  { %v785_v50 = vsub.f32 %v23_v0, %v49_v46  ;;  %v787_v51 = vsub.f32 %v24_v1, %v49_v46  ;;  %v789_v52 = vsub.f32 %v26_v2, %v59_v47  ;;  %v791_v53 = vsub.f32 %v27_v3, %v59_v47  ;;  %654 = vst [vmem:[#allocation5 + $0x51] sm:$0x1] %v49_v46 }
  0x2a   :  { %655 = vst [vmem:[#allocation5 + $0x52] sm:$0x1] %v59_v47  ;;  %v793_v54 = vsub.f32 %v29_v4, %v69_v48  ;;  %v795_v55 = vsub.f32 %v30_v5, %v69_v48  ;;  %v797_v56 = vsub.f32 %v32_v6, %v79_v49  ;;  %v799_v57 = vsub.f32 %v33_v7, %v79_v49 }
  0x2b   :  { %657 = vst [vmem:[#allocation5 + $0x54] sm:$0x1] %v69_v48  ;;  %658 = vst [vmem:[#allocation5 + $0x55] sm:$0x1] %v79_v49  ;;  %v88_v58 = vmul.f32 %v785_v50, %v785_v50  ;;  %v89_v59 = vmul.f32 %v787_v51, %v787_v51  ;;  %v90_v60 = vmul.f32 %v789_v52, %v789_v52 }
  0x2c   :  { %v91_v61 = vmul.f32 %v791_v53, %v791_v53  ;;  %v118_v62 = vmul.f32 %v793_v54, %v793_v54  ;;  %v119_v63 = vmul.f32 %v795_v55, %v795_v55  ;;  %v120_v0 = vmul.f32 %v797_v56, %v797_v56 }
  0x2d   :  { %v121_v1 = vmul.f32 %v799_v57, %v799_v57  ;;  %v92_v2 = vadd.f32 %v90_v60, %v88_v58  ;;  %v648_v41 = vadd.f32 %v647_v38, %v646_v35 }
  0x2e   :  { %v93_v3 = vadd.f32 %v91_v61, %v89_v59  ;;  %v122_v4 = vadd.f32 %v120_v0, %v118_v62  ;;  %v746_v62 = vmov 0.0  }
  0x2f   :  { %v123_v5 = vadd.f32 %v121_v1, %v119_v63  ;;  %683 = vrsqrt.f32 %v92_v2  ;;  %vm96_vm0 = vcmp.eq.f32.partialorder %v92_v2, inf  ;;  %vm98_vm1 = vcmp.eq.f32.partialorder %v92_v2, 0.0  ;;  %660 = vst [vmem:[#allocation5 + $0x57] sm:$0x1] %v746_v62 }
  0x30   :  { %685 = vrsqrt.f32 %v93_v3  ;;  %v99_v7 = vand.u32 2147483648, %v92_v2  ;;  %vm103_vm2 = vcmp.eq.f32.partialorder %v93_v3, inf  ;;  %vm105_vm3 = vcmp.eq.f32.partialorder %v93_v3, 0.0 }
  0x31   :  { %687 = vrsqrt.f32 %v122_v4  ;;  %v106_v12 = vand.u32 2147483648, %v93_v3  ;;  %vm126_vm4 = vcmp.eq.f32.partialorder %v122_v4, inf  ;;  %vm128_vm5 = vcmp.eq.f32.partialorder %v122_v4, 0.0 }
  0x32   :  { %689 = vrsqrt.f32 %v123_v5  ;;  %v129_v15 = vand.u32 2147483648, %v122_v4  ;;  %vm133_vm6 = vcmp.eq.f32.partialorder %v123_v5, inf  ;;  %v136_v19 = vand.u32 2147483648, %v123_v5 }
  0x33   :  { %vm135_vm7 = vcmp.eq.f32.partialorder %v123_v5, 0.0  ;;  %v649_v44 = vrot.slane %v648_v41, 2 }
  0x35   :  { %v650_v47 = vadd.f32 %v649_v44, %v648_v41 }
  0x37   :  { %v651_v49 = vrot.slane %v650_v47, 1 }
  0x39   :  { %v684_v6 = vpop.eup %683  ;;  %v652_v59 = vadd.f32 %v651_v49, %v650_v47 }
  0x3a   :  { %v686_v10 = vpop.eup %685  ;;  %v95_v11 = vmul.f32 %v684_v6, %v92_v2 }
  0x3b   :  { %v688_v13 = vpop.eup %687  ;;  %v102_v14 = vmul.f32 %v686_v10, %v93_v3  ;;  %653 = vst [vmem:[#allocation5 + $0x50] sm:$0x1] %v652_v59 }
  0x3c   :  { %v690_v16 = vpop.eup %689  ;;  %v97_v17 = vsel %vm96_vm0, %v92_v2, %v95_v11  ;;  %v125_v18 = vmul.f32 %v688_v13, %v122_v4 }
  0x3d   :  { %v100_v20 = vsel %vm98_vm1, %v99_v7, %v97_v17  ;;  %v104_v21 = vsel %vm103_vm2, %v93_v3, %v102_v14  ;;  %v132_v22 = vmul.f32 %v690_v16, %v123_v5 }
  0x3e   :  { %v107_v23 = vsel %vm105_vm3, %v106_v12, %v104_v21  ;;  %v108_v24 = vmul.f32 %v100_v20, %v773_v8  ;;  %v127_v25 = vsel %vm126_vm4, %v122_v4, %v125_v18 }
  0x3f   :  { %v109_v26 = vmul.f32 %v107_v23, %v775_v9  ;;  %v130_v27 = vsel %vm128_vm5, %v129_v15, %v127_v25  ;;  %v134_v28 = vsel %vm133_vm6, %v123_v5, %v132_v22 }
  0x40   :  { %v137_v31 = vsel %vm135_vm7, %v136_v19, %v134_v28  ;;  %v138_v32 = vmul.f32 %v130_v27, %v773_v8 }
  0x41   :  { %v110_v33 = vadd.f32 %v109_v26, %v108_v24  ;;  %v139_v34 = vmul.f32 %v137_v31, %v775_v9 }
  0x43   :  { %v111_v36 = vrot.slane %v110_v33, 4  ;;  %v140_v37 = vadd.f32 %v139_v34, %v138_v32 }
  0x45   :  { %v112_v39 = vadd.f32 %v111_v36, %v110_v33  ;;  %v141_v40 = vrot.slane %v140_v37, 4 }
  0x47   :  { %v113_v42 = vrot.slane %v112_v39, 2  ;;  %v142_v43 = vadd.f32 %v141_v40, %v140_v37 }
  0x49   :  { %v114_v45 = vadd.f32 %v113_v42, %v112_v39  ;;  %v143_v46 = vrot.slane %v142_v43, 2 }
  0x4b   :  { %v115_v48 = vrot.slane %v114_v45, 1  ;;  %v144_v8 = vadd.f32 %v143_v46, %v142_v43 }
  0x4d   :  { %v116_v58 = vadd.f32 %v115_v48, %v114_v45  ;;  %v145_v9 = vrot.slane %v144_v8, 1 }
  0x4f   :  { %v117_v60 = vmul.f32 0.0625, %v116_v58  ;;  %v146_v61 = vadd.f32 %v145_v9, %v144_v8 }
  0x51   :  { %v147_v63 = vmul.f32 0.0625, %v146_v61  ;;  %v148_v0 = vadd.f32 1e-08, %v117_v60 }
  0x53   :  { %691 = vrcp.f32 %v148_v0  ;;  %v151_v1 = vadd.f32 1e-08, %v147_v63 }
  0x55   :  { %693 = vrcp.f32 %v151_v1 }
  0x5d   :  { %v692_v2 = vpop.eup %691 }
  0x5e   :  { %v150_v3 = vmul.f32 1.4142135, %v692_v2 }
  0x5f   :  { %v694_v4 = vpop.eup %693 }
  0x60   :  { %v153_v5 = vmul.f32 1.4142135, %v694_v4  ;;  %v830_v6 = vmul.f32 %v150_v3, %v785_v50  ;;  %v833_v7 = vmul.f32 %v150_v3, %v787_v51  ;;  %v836_v10 = vmul.f32 %v150_v3, %v789_v52  ;;  %656 = vst [vmem:[#allocation5 + $0x53] sm:$0x1] %v150_v3 }
  0x61   :  { %v839_v11 = vmul.f32 %v150_v3, %v791_v53 }
  0x62   :  { %v842_v12 = vmul.f32 %v153_v5, %v793_v54  ;;  %v845_v13 = vmul.f32 %v153_v5, %v795_v55  ;;  %v848_v14 = vmul.f32 %v153_v5, %v797_v56  ;;  %v851_v50 = vmul.f32 %v153_v5, %v799_v57  ;;  %659 = vst [vmem:[#allocation5 + $0x56] sm:$0x1] %v153_v5 }
  0x63   :  { %v855_v51 = vmul.f32 %v830_v6, %v821_v29  ;;  %v859_v52 = vmul.f32 %v833_v7, %v823_v30  ;;  %v863_v53 = vmul.f32 %v836_v10, %v821_v29  ;;  %v867_v54 = vmul.f32 %v839_v11, %v823_v30 }
  0x64   :  { %v162_v55 = vmul.f32 %v842_v12, %v830_v6  ;;  %v163_v56 = vmul.f32 %v845_v13, %v833_v7  ;;  %v875_v57 = vmul.f32 %v842_v12, %v836_v10  ;;  %v879_v15 = vmul.f32 %v845_v13, %v839_v11 }
  0x65   :  { %v883_v16 = vmul.f32 %v848_v14, %v830_v6  ;;  %v887_v17 = vmul.f32 %v851_v50, %v833_v7  ;;  %v891_v18 = vmul.f32 %v848_v14, %v836_v10  ;;  %v895_v19 = vmul.f32 %v851_v50, %v839_v11 }
  0x66   :  { %v898_v20 = vmul.f32 %v162_v55, %v821_v29  ;;  %v901_v21 = vmul.f32 %v163_v56, %v823_v30  ;;  %v905_v22 = vmul.f32 %v875_v57, %v821_v29  ;;  %v909_v23 = vmul.f32 %v879_v15, %v823_v30 }
  0x67   :  { %v913_v24 = vmul.f32 %v842_v12, %v821_v29  ;;  %v917_v25 = vmul.f32 %v845_v13, %v823_v30  ;;  %v921_v26 = vmul.f32 %v883_v16, %v821_v29  ;;  %v925_v27 = vmul.f32 %v887_v17, %v823_v30 }
  0x68   :  { %v186_v28 = vmul.f32 %v898_v20, %v162_v55  ;;  %v187_v31 = vmul.f32 %v901_v21, %v163_v56  ;;  %v196_v32 = vmul.f32 %v898_v20, %v875_v57  ;;  %v197_v33 = vmul.f32 %v901_v21, %v879_v15 }
  0x69   :  { %v207_v34 = vmul.f32 %v898_v20, %v842_v12  ;;  %v208_v35 = vmul.f32 %v901_v21, %v845_v13  ;;  %v218_v36 = vmul.f32 %v898_v20, %v883_v16  ;;  %v219_v37 = vmul.f32 %v901_v21, %v887_v17 }
  0x6a   :  { %v188_v38 = vadd.f32 %v187_v31, %v186_v28  ;;  %v198_v39 = vadd.f32 %v197_v33, %v196_v32  ;;  %v229_v40 = vmul.f32 %v898_v20, %v891_v18  ;;  %v230_v41 = vmul.f32 %v901_v21, %v895_v19 }
  0x6b   :  { %v209_v42 = vadd.f32 %v208_v35, %v207_v34  ;;  %v220_v43 = vadd.f32 %v219_v37, %v218_v36  ;;  %v240_v44 = vmul.f32 %v898_v20, %v848_v14  ;;  %v241_v45 = vmul.f32 %v901_v21, %v851_v50 }
  0x6c   :  { %v189_v46 = vrot.slane %v188_v38, 4  ;;  %v199_v47 = vrot.slane %v198_v39, 4  ;;  %v231_v48 = vadd.f32 %v230_v41, %v229_v40  ;;  %v251_v8 = vmul.f32 %v898_v20, %v830_v6 }
  0x6d   :  { %v210_v49 = vrot.slane %v209_v42, 4  ;;  %v221_v58 = vrot.slane %v220_v43, 4  ;;  %v242_v9 = vadd.f32 %v241_v45, %v240_v44  ;;  %v252_v59 = vmul.f32 %v901_v21, %v833_v7 }
  0x6e   :  { %v190_v60 = vadd.f32 %v189_v46, %v188_v38  ;;  %v200_v61 = vadd.f32 %v199_v47, %v198_v39  ;;  %v232_v62 = vrot.slane %v231_v48, 4  ;;  %v262_v63 = vmul.f32 %v898_v20, %v836_v10 }
  0x6f   :  { %v211_v0 = vadd.f32 %v210_v49, %v209_v42  ;;  %v222_v1 = vadd.f32 %v221_v58, %v220_v43  ;;  %v243_v2 = vrot.slane %v242_v9, 4  ;;  %v253_v3 = vadd.f32 %v252_v59, %v251_v8 }
  0x70   :  { %v191_v4 = vrot.slane %v190_v60, 2  ;;  %v201_v5 = vrot.slane %v200_v61, 2  ;;  %v233_v55 = vadd.f32 %v232_v62, %v231_v48  ;;  %v263_v56 = vmul.f32 %v901_v21, %v839_v11 }
  0x71   :  { %v212_v28 = vrot.slane %v211_v0, 2  ;;  %v223_v31 = vrot.slane %v222_v1, 2  ;;  %v244_v32 = vadd.f32 %v243_v2, %v242_v9  ;;  %v254_v33 = vrot.slane %v253_v3, 4 }
  0x72   :  { %v192_v34 = vadd.f32 %v191_v4, %v190_v60  ;;  %v202_v35 = vadd.f32 %v201_v5, %v200_v61  ;;  %v234_v36 = vrot.slane %v233_v55, 2  ;;  %v264_v37 = vadd.f32 %v263_v56, %v262_v63 }
  0x73   :  { %v213_v38 = vadd.f32 %v212_v28, %v211_v0  ;;  %v224_v39 = vadd.f32 %v223_v31, %v222_v1  ;;  %v245_v40 = vrot.slane %v244_v32, 2  ;;  %v255_v41 = vadd.f32 %v254_v33, %v253_v3 }
  0x74   :  { %v193_v42 = vrot.slane %v192_v34, 1  ;;  %v203_v43 = vrot.slane %v202_v35, 1  ;;  %v235_v44 = vadd.f32 %v234_v36, %v233_v55  ;;  %v265_v45 = vrot.slane %v264_v37, 4 }
  0x75   :  { %v214_v46 = vrot.slane %v213_v38, 1  ;;  %v225_v47 = vrot.slane %v224_v39, 1  ;;  %v246_v48 = vadd.f32 %v245_v40, %v244_v32  ;;  %v256_v8 = vrot.slane %v255_v41, 2 }
  0x76   :  { %v194_v49 = vadd.f32 %v193_v42, %v192_v34  ;;  %v204_v58 = vadd.f32 %v203_v43, %v202_v35  ;;  %v236_v9 = vrot.slane %v235_v44, 1  ;;  %v266_v59 = vadd.f32 %v265_v45, %v264_v37 }
  0x77   :  { %v215_v60 = vadd.f32 %v214_v46, %v213_v38  ;;  %v226_v61 = vadd.f32 %v225_v47, %v224_v39  ;;  %v247_v62 = vrot.slane %v246_v48, 1  ;;  %v257_v63 = vadd.f32 %v256_v8, %v255_v41 }
  0x78   :  { %195 = vst [vmem:[#allocation5] sm:$0x1] %v194_v49  ;;  %205 = vst [vmem:[#allocation5 + $0x1] sm:$0x1] %v204_v58  ;;  %v237_v0 = vadd.f32 %v236_v9, %v235_v44  ;;  %v267_v1 = vrot.slane %v266_v59, 2  ;;  %v273_v2 = vadd.f32 %v901_v21, %v898_v20  ;;  %v282_v3 = vmul.f32 %v905_v22, %v875_v57 }
  0x79   :  { %206 = vst [vmem:[#allocation5 + $0x9] sm:$0x1] %v204_v58  ;;  %216 = vst [vmem:[#allocation5 + $0x2] sm:$0x1] %v215_v60  ;;  %v248_v4 = vadd.f32 %v247_v62, %v246_v48  ;;  %v258_v5 = vrot.slane %v257_v63, 1  ;;  %v283_v55 = vmul.f32 %v909_v23, %v879_v15  ;;  %v292_v56 = vmul.f32 %v905_v22, %v842_v12 }
  0x7a   :  { %217 = vst [vmem:[#allocation5 + $0x12] sm:$0x1] %v215_v60  ;;  %227 = vst [vmem:[#allocation5 + $0x3] sm:$0x1] %v226_v61  ;;  %v268_v28 = vadd.f32 %v267_v1, %v266_v59  ;;  %v274_v31 = vrot.slane %v273_v2, 4  ;;  %v293_v20 = vmul.f32 %v909_v23, %v845_v13  ;;  %v303_v57 = vmul.f32 %v905_v22, %v883_v16 }
  0x7b   :  { %228 = vst [vmem:[#allocation5 + $0x1b] sm:$0x1] %v226_v61  ;;  %238 = vst [vmem:[#allocation5 + $0x4] sm:$0x1] %v237_v0  ;;  %v259_v21 = vadd.f32 %v258_v5, %v257_v63  ;;  %v284_v32 = vadd.f32 %v283_v55, %v282_v3  ;;  %v304_v15 = vmul.f32 %v909_v23, %v887_v17 }
  0x7c   :  { %239 = vst [vmem:[#allocation5 + $0x24] sm:$0x1] %v237_v0  ;;  %249 = vst [vmem:[#allocation5 + $0x5] sm:$0x1] %v248_v4  ;;  %v314_v33 = vmul.f32 %v905_v22, %v891_v18  ;;  %v269_v34 = vrot.slane %v268_v28, 1  ;;  %v275_v35 = vadd.f32 %v274_v31, %v273_v2  ;;  %v294_v36 = vadd.f32 %v293_v20, %v292_v56 }
  0x7d   :  { %250 = vst [vmem:[#allocation5 + $0x2d] sm:$0x1] %v248_v4  ;;  %v315_v37 = vmul.f32 %v909_v23, %v895_v19  ;;  %260 = vst [vmem:[#allocation5 + $0x6] sm:$0x1] %v259_v21  ;;  %v285_v38 = vrot.slane %v284_v32, 4  ;;  %v305_v39 = vadd.f32 %v304_v15, %v303_v57  ;;  %v325_v40 = vmul.f32 %v905_v22, %v848_v14 }
  0x7e   :  { %261 = vst [vmem:[#allocation5 + $0x36] sm:$0x1] %v259_v21  ;;  %v326_v41 = vmul.f32 %v909_v23, %v851_v50  ;;  %v270_v42 = vadd.f32 %v269_v34, %v268_v28  ;;  %v276_v43 = vrot.slane %v275_v35, 2  ;;  %v295_v44 = vrot.slane %v294_v36, 4 }
  0x7f   :  { %v316_v45 = vadd.f32 %v315_v37, %v314_v33  ;;  %v286_v46 = vadd.f32 %v285_v38, %v284_v32  ;;  %v306_v47 = vrot.slane %v305_v39, 4  ;;  %v336_v8 = vmul.f32 %v905_v22, %v830_v6 }
  0x80   :  { %v327_v48 = vadd.f32 %v326_v41, %v325_v40  ;;  %271 = vst [vmem:[#allocation5 + $0x7] sm:$0x1] %v270_v42  ;;  %272 = vst [vmem:[#allocation5 + $0x3f] sm:$0x1] %v270_v42  ;;  %v277_v49 = vadd.f32 %v276_v43, %v275_v35  ;;  %v296_v58 = vadd.f32 %v295_v44, %v294_v36 }
  0x81   :  { %v317_v9 = vrot.slane %v316_v45, 4  ;;  %v337_v59 = vmul.f32 %v909_v23, %v833_v7  ;;  %v287_v60 = vrot.slane %v286_v46, 2  ;;  %v307_v61 = vadd.f32 %v306_v47, %v305_v39 }
  0x82   :  { %v328_v62 = vrot.slane %v327_v48, 4  ;;  %v347_v63 = vmul.f32 %v905_v22, %v836_v10  ;;  %v278_v0 = vrot.slane %v277_v49, 1  ;;  %v297_v1 = vrot.slane %v296_v58, 2 }
  0x83   :  { %v318_v2 = vadd.f32 %v317_v9, %v316_v45  ;;  %v338_v3 = vadd.f32 %v337_v59, %v336_v8  ;;  %v288_v4 = vadd.f32 %v287_v60, %v286_v46  ;;  %v308_v5 = vrot.slane %v307_v61, 2 }
  0x84   :  { %v329_v55 = vadd.f32 %v328_v62, %v327_v48  ;;  %v348_v56 = vmul.f32 %v909_v23, %v839_v11  ;;  %v279_v28 = vadd.f32 %v278_v0, %v277_v49  ;;  %v298_v31 = vadd.f32 %v297_v1, %v296_v58 }
  0x85   :  { %v319_v20 = vrot.slane %v318_v2, 2  ;;  %v339_v57 = vrot.slane %v338_v3, 4  ;;  %v289_v21 = vrot.slane %v288_v4, 1  ;;  %v309_v32 = vadd.f32 %v308_v5, %v307_v61 }
  0x86   :  { %v330_v15 = vrot.slane %v329_v55, 2  ;;  %v349_v33 = vadd.f32 %v348_v56, %v347_v63  ;;  %280 = vst [vmem:[#allocation5 + $0x8] sm:$0x1] %v279_v28  ;;  %281 = vst [vmem:[#allocation5 + $0x48] sm:$0x1] %v279_v28  ;;  %v299_v34 = vrot.slane %v298_v31, 1  ;;  %v358_v37 = vadd.f32 %v909_v23, %v905_v22 }
  0x87   :  { %v320_v35 = vadd.f32 %v319_v20, %v318_v2  ;;  %v340_v36 = vadd.f32 %v339_v57, %v338_v3  ;;  %v290_v38 = vadd.f32 %v289_v21, %v288_v4  ;;  %v310_v39 = vrot.slane %v309_v32, 1 }
  0x88   :  { %v331_v40 = vadd.f32 %v330_v15, %v329_v55  ;;  %v350_v41 = vrot.slane %v349_v33, 4  ;;  %v300_v42 = vadd.f32 %v299_v34, %v298_v31  ;;  %v359_v45 = vrot.slane %v358_v37, 4 }
  0x89   :  { %v321_v43 = vrot.slane %v320_v35, 1  ;;  %v341_v44 = vrot.slane %v340_v36, 2  ;;  %291 = vst [vmem:[#allocation5 + $0xa] sm:$0x1] %v290_v38  ;;  %v311_v46 = vadd.f32 %v310_v39, %v309_v32  ;;  %v367_v8 = vmul.f32 %v913_v24, %v842_v12 }
  0x8a   :  { %v332_v47 = vrot.slane %v331_v40, 1  ;;  %v351_v48 = vadd.f32 %v350_v41, %v349_v33  ;;  %301 = vst [vmem:[#allocation5 + $0xb] sm:$0x1] %v300_v42  ;;  %302 = vst [vmem:[#allocation5 + $0x13] sm:$0x1] %v300_v42  ;;  %v360_v22 = vadd.f32 %v359_v45, %v358_v37  ;;  %v368_v23 = vmul.f32 %v917_v25, %v845_v13 }
  0x8b   :  { %v322_v49 = vadd.f32 %v321_v43, %v320_v35  ;;  %v342_v58 = vadd.f32 %v341_v44, %v340_v36  ;;  %312 = vst [vmem:[#allocation5 + $0xc] sm:$0x1] %v311_v46  ;;  %313 = vst [vmem:[#allocation5 + $0x1c] sm:$0x1] %v311_v46  ;;  %v377_v60 = vmul.f32 %v913_v24, %v883_v16 }
  0x8c   :  { %v333_v9 = vadd.f32 %v332_v47, %v331_v40  ;;  %v352_v59 = vrot.slane %v351_v48, 2  ;;  %v378_v61 = vmul.f32 %v917_v25, %v887_v17  ;;  %v361_v62 = vrot.slane %v360_v22, 2 }
  0x8d   :  { %323 = vst [vmem:[#allocation5 + $0xd] sm:$0x1] %v322_v49  ;;  %324 = vst [vmem:[#allocation5 + $0x25] sm:$0x1] %v322_v49  ;;  %v343_v12 = vrot.slane %v342_v58, 1  ;;  %v369_v63 = vadd.f32 %v368_v23, %v367_v8  ;;  %v388_v0 = vmul.f32 %v913_v24, %v891_v18  ;;  %v389_v2 = vmul.f32 %v917_v25, %v895_v19 }
  0x8e   :  { %334 = vst [vmem:[#allocation5 + $0xe] sm:$0x1] %v333_v9  ;;  %335 = vst [vmem:[#allocation5 + $0x2e] sm:$0x1] %v333_v9  ;;  %v353_v13 = vadd.f32 %v352_v59, %v351_v48  ;;  %v379_v1 = vadd.f32 %v378_v61, %v377_v60  ;;  %v399_v3 = vmul.f32 %v913_v24, %v848_v14 }
  0x8f   :  { %v344_v4 = vadd.f32 %v343_v12, %v342_v58  ;;  %v362_v5 = vadd.f32 %v361_v62, %v360_v22  ;;  %v370_v55 = vrot.slane %v369_v63, 4  ;;  %v400_v56 = vmul.f32 %v917_v25, %v851_v50 }
  0x90   :  { %v354_v28 = vrot.slane %v353_v13, 1  ;;  %v380_v31 = vrot.slane %v379_v1, 4  ;;  %v390_v20 = vadd.f32 %v389_v2, %v388_v0  ;;  %v410_v57 = vmul.f32 %v913_v24, %v830_v6 }
  0x91   :  { %345 = vst [vmem:[#allocation5 + $0xf] sm:$0x1] %v344_v4  ;;  %346 = vst [vmem:[#allocation5 + $0x37] sm:$0x1] %v344_v4  ;;  %v363_v21 = vrot.slane %v362_v5, 1  ;;  %v371_v32 = vadd.f32 %v370_v55, %v369_v63  ;;  %v401_v15 = vadd.f32 %v400_v56, %v399_v3  ;;  %v411_v33 = vmul.f32 %v917_v25, %v833_v7 }
  0x92   :  { %v355_v34 = vadd.f32 %v354_v28, %v353_v13  ;;  %v381_v35 = vadd.f32 %v380_v31, %v379_v1  ;;  %v391_v36 = vrot.slane %v390_v20, 4  ;;  %v421_v37 = vmul.f32 %v913_v24, %v836_v10 }
  0x93   :  { %v364_v38 = vadd.f32 %v363_v21, %v362_v5  ;;  %v372_v39 = vrot.slane %v371_v32, 2  ;;  %v402_v40 = vrot.slane %v401_v15, 4  ;;  %v412_v41 = vadd.f32 %v411_v33, %v410_v57 }
  0x94   :  { %356 = vst [vmem:[#allocation5 + $0x10] sm:$0x1] %v355_v34  ;;  %357 = vst [vmem:[#allocation5 + $0x40] sm:$0x1] %v355_v34  ;;  %v382_v42 = vrot.slane %v381_v35, 2  ;;  %v392_v43 = vadd.f32 %v391_v36, %v390_v20  ;;  %v422_v44 = vmul.f32 %v917_v25, %v839_v11  ;;  %v432_v45 = vadd.f32 %v917_v25, %v913_v24 }
  0x95   :  { %365 = vst [vmem:[#allocation5 + $0x11] sm:$0x1] %v364_v38  ;;  %366 = vst [vmem:[#allocation5 + $0x49] sm:$0x1] %v364_v38  ;;  %v373_v46 = vadd.f32 %v372_v39, %v371_v32  ;;  %v403_v47 = vadd.f32 %v402_v40, %v401_v15  ;;  %v413_v48 = vrot.slane %v412_v41, 4  ;;  %v441_v8 = vmul.f32 %v921_v26, %v883_v16 }
  0x96   :  { %v383_v49 = vadd.f32 %v382_v42, %v381_v35  ;;  %v393_v58 = vrot.slane %v392_v43, 2  ;;  %v423_v22 = vadd.f32 %v422_v44, %v421_v37  ;;  %v433_v23 = vrot.slane %v432_v45, 4 }
  0x97   :  { %v374_v9 = vrot.slane %v373_v46, 1  ;;  %v404_v59 = vrot.slane %v403_v47, 2  ;;  %v414_v60 = vadd.f32 %v413_v48, %v412_v41  ;;  %v442_v61 = vmul.f32 %v925_v27, %v887_v17 }
  0x98   :  { %v384_v12 = vrot.slane %v383_v49, 1  ;;  %v394_v24 = vadd.f32 %v393_v58, %v392_v43  ;;  %v424_v25 = vrot.slane %v423_v22, 4  ;;  %v434_v62 = vadd.f32 %v433_v23, %v432_v45 }
  0x99   :  { %v375_v63 = vadd.f32 %v374_v9, %v373_v46  ;;  %v405_v0 = vadd.f32 %v404_v59, %v403_v47  ;;  %v415_v13 = vrot.slane %v414_v60, 2  ;;  %v443_v1 = vadd.f32 %v442_v61, %v441_v8 }
  0x9a   :  { %v385_v2 = vadd.f32 %v384_v12, %v383_v49  ;;  %v395_v16 = vrot.slane %v394_v24, 1  ;;  %v425_v3 = vadd.f32 %v424_v25, %v423_v22  ;;  %v435_v4 = vrot.slane %v434_v62, 2 }
  0x9b   :  { %376 = vst [vmem:[#allocation5 + $0x14] sm:$0x1] %v375_v63  ;;  %v406_v5 = vrot.slane %v405_v0, 1  ;;  %v416_v55 = vadd.f32 %v415_v13, %v414_v60  ;;  %v444_v56 = vrot.slane %v443_v1, 4  ;;  %v451_v28 = vmul.f32 %v921_v26, %v891_v18 }
  0x9c   :  { %386 = vst [vmem:[#allocation5 + $0x15] sm:$0x1] %v385_v2  ;;  %387 = vst [vmem:[#allocation5 + $0x1d] sm:$0x1] %v385_v2  ;;  %v396_v17 = vadd.f32 %v395_v16, %v394_v24  ;;  %v426_v31 = vrot.slane %v425_v3, 2  ;;  %v436_v20 = vadd.f32 %v435_v4, %v434_v62  ;;  %v452_v57 = vmul.f32 %v925_v27, %v895_v19 }
  0x9d   :  { %v407_v21 = vadd.f32 %v406_v5, %v405_v0  ;;  %v417_v32 = vrot.slane %v416_v55, 1  ;;  %v445_v15 = vadd.f32 %v444_v56, %v443_v1  ;;  %v462_v33 = vmul.f32 %v921_v26, %v848_v14 }
  0x9e   :  { %397 = vst [vmem:[#allocation5 + $0x16] sm:$0x1] %v396_v17  ;;  %398 = vst [vmem:[#allocation5 + $0x26] sm:$0x1] %v396_v17  ;;  %v427_v34 = vadd.f32 %v426_v31, %v425_v3  ;;  %v437_v35 = vrot.slane %v436_v20, 1  ;;  %v453_v36 = vadd.f32 %v452_v57, %v451_v28  ;;  %v463_v37 = vmul.f32 %v925_v27, %v851_v50 }
  0x9f   :  { %408 = vst [vmem:[#allocation5 + $0x17] sm:$0x1] %v407_v21  ;;  %409 = vst [vmem:[#allocation5 + $0x2f] sm:$0x1] %v407_v21  ;;  %v418_v38 = vadd.f32 %v417_v32, %v416_v55  ;;  %v446_v39 = vrot.slane %v445_v15, 2  ;;  %v473_v40 = vmul.f32 %v921_v26, %v830_v6  ;;  %v474_v41 = vmul.f32 %v925_v27, %v833_v7 }
  0xa0   :  { %v428_v42 = vrot.slane %v427_v34, 1  ;;  %v438_v43 = vadd.f32 %v437_v35, %v436_v20  ;;  %v454_v44 = vrot.slane %v453_v36, 4  ;;  %v464_v45 = vadd.f32 %v463_v37, %v462_v33 }
  0xa1   :  { %419 = vst [vmem:[#allocation5 + $0x18] sm:$0x1] %v418_v38  ;;  %420 = vst [vmem:[#allocation5 + $0x38] sm:$0x1] %v418_v38  ;;  %v447_v46 = vadd.f32 %v446_v39, %v445_v15  ;;  %v475_v47 = vadd.f32 %v474_v41, %v473_v40  ;;  %v484_v48 = vmul.f32 %v921_v26, %v836_v10 }
  0xa2   :  { %v485_v8 = vmul.f32 %v925_v27, %v839_v11  ;;  %v429_v49 = vadd.f32 %v428_v42, %v427_v34  ;;  %439 = vst [vmem:[#allocation5 + $0x1a] sm:$0x1] %v438_v43  ;;  %440 = vst [vmem:[#allocation5 + $0x4a] sm:$0x1] %v438_v43  ;;  %v455_v58 = vadd.f32 %v454_v44, %v453_v36  ;;  %v465_v22 = vrot.slane %v464_v45, 4 }
  0xa3   :  { %v495_v23 = vadd.f32 %v925_v27, %v921_v26  ;;  %v448_v9 = vrot.slane %v447_v46, 1  ;;  %v476_v59 = vrot.slane %v475_v47, 4  ;;  %v178_v61 = vmul.f32 %v891_v18, %v821_v29 }
  0xa4   :  { %v486_v60 = vadd.f32 %v485_v8, %v484_v48  ;;  %430 = vst [vmem:[#allocation5 + $0x19] sm:$0x1] %v429_v49  ;;  %431 = vst [vmem:[#allocation5 + $0x41] sm:$0x1] %v429_v49  ;;  %v456_v12 = vrot.slane %v455_v58, 2  ;;  %v466_v24 = vadd.f32 %v465_v22, %v464_v45  ;;  %v179_v62 = vmul.f32 %v895_v19, %v823_v30 }
  0xa5   :  { %v496_v25 = vrot.slane %v495_v23, 4  ;;  %v449_v63 = vadd.f32 %v448_v9, %v447_v46  ;;  %v477_v0 = vadd.f32 %v476_v59, %v475_v47  ;;  %v504_v1 = vmul.f32 %v178_v61, %v891_v18 }
  0xa6   :  { %v487_v13 = vrot.slane %v486_v60, 4  ;;  %v457_v26 = vadd.f32 %v456_v12, %v455_v58  ;;  %v467_v27 = vrot.slane %v466_v24, 2  ;;  %v505_v16 = vmul.f32 %v179_v62, %v895_v19 }
  0xa7   :  { %v497_v2 = vadd.f32 %v496_v25, %v495_v23  ;;  %450 = vst [vmem:[#allocation5 + $0x1e] sm:$0x1] %v449_v63  ;;  %v478_v3 = vrot.slane %v477_v0, 2  ;;  %v514_v5 = vmul.f32 %v178_v61, %v848_v14  ;;  %v515_v55 = vmul.f32 %v179_v62, %v851_v50 }
  0xa8   :  { %v488_v4 = vadd.f32 %v487_v13, %v486_v60  ;;  %v458_v56 = vrot.slane %v457_v26, 1  ;;  %v468_v28 = vadd.f32 %v467_v27, %v466_v24  ;;  %v506_v31 = vadd.f32 %v505_v16, %v504_v1 }
  0xa9   :  { %v498_v17 = vrot.slane %v497_v2, 2  ;;  %v479_v20 = vadd.f32 %v478_v3, %v477_v0  ;;  %v516_v21 = vadd.f32 %v515_v55, %v514_v5  ;;  %v525_v18 = vmul.f32 %v178_v61, %v830_v6 }
  0xaa   :  { %v489_v57 = vrot.slane %v488_v4, 2  ;;  %v459_v32 = vadd.f32 %v458_v56, %v457_v26  ;;  %v469_v15 = vrot.slane %v468_v28, 1  ;;  %v507_v19 = vrot.slane %v506_v31, 4 }
  0xab   :  { %v499_v33 = vadd.f32 %v498_v17, %v497_v2  ;;  %v480_v34 = vrot.slane %v479_v20, 1  ;;  %v517_v36 = vrot.slane %v516_v21, 4  ;;  %v526_v37 = vmul.f32 %v179_v62, %v833_v7 }
  0xac   :  { %v490_v35 = vadd.f32 %v489_v57, %v488_v4  ;;  %460 = vst [vmem:[#allocation5 + $0x1f] sm:$0x1] %v459_v32  ;;  %461 = vst [vmem:[#allocation5 + $0x27] sm:$0x1] %v459_v32  ;;  %v470_v38 = vadd.f32 %v469_v15, %v468_v28  ;;  %v508_v40 = vadd.f32 %v507_v19, %v506_v31 }
  0xad   :  { %v500_v39 = vrot.slane %v499_v33, 1  ;;  %v536_v41 = vmul.f32 %v178_v61, %v836_v10  ;;  %v481_v42 = vadd.f32 %v480_v34, %v479_v20  ;;  %v518_v44 = vadd.f32 %v517_v36, %v516_v21 }
  0xae   :  { %v491_v43 = vrot.slane %v490_v35, 1  ;;  %v527_v45 = vadd.f32 %v526_v37, %v525_v18  ;;  %471 = vst [vmem:[#allocation5 + $0x20] sm:$0x1] %v470_v38  ;;  %472 = vst [vmem:[#allocation5 + $0x30] sm:$0x1] %v470_v38  ;;  %v509_v47 = vrot.slane %v508_v40, 2  ;;  %v537_v48 = vmul.f32 %v179_v62, %v839_v11 }
  0xaf   :  { %v501_v46 = vadd.f32 %v500_v39, %v499_v33  ;;  %v547_v8 = vadd.f32 %v179_v62, %v178_v61  ;;  %482 = vst [vmem:[#allocation5 + $0x21] sm:$0x1] %v481_v42  ;;  %483 = vst [vmem:[#allocation5 + $0x39] sm:$0x1] %v481_v42  ;;  %v519_v58 = vrot.slane %v518_v44, 2  ;;  %v180_v23 = vmul.f32 %v848_v14, %v821_v29 }
  0xb0   :  { %v492_v49 = vadd.f32 %v491_v43, %v490_v35  ;;  %v528_v22 = vrot.slane %v527_v45, 4  ;;  %v510_v9 = vadd.f32 %v509_v47, %v508_v40  ;;  %v538_v59 = vadd.f32 %v537_v48, %v536_v41 }
  0xb1   :  { %502 = vst [vmem:[#allocation5 + $0x23] sm:$0x1] %v501_v46  ;;  %503 = vst [vmem:[#allocation5 + $0x4b] sm:$0x1] %v501_v46  ;;  %v548_v60 = vrot.slane %v547_v8, 4  ;;  %v181_v12 = vmul.f32 %v851_v50, %v823_v30  ;;  %v520_v24 = vadd.f32 %v519_v58, %v518_v44  ;;  %v556_v25 = vmul.f32 %v180_v23, %v848_v14 }
  0xb2   :  { %493 = vst [vmem:[#allocation5 + $0x22] sm:$0x1] %v492_v49  ;;  %494 = vst [vmem:[#allocation5 + $0x42] sm:$0x1] %v492_v49  ;;  %v529_v61 = vadd.f32 %v528_v22, %v527_v45  ;;  %v566_v62 = vmul.f32 %v180_v23, %v830_v6  ;;  %v511_v63 = vrot.slane %v510_v9, 1  ;;  %v539_v0 = vrot.slane %v538_v59, 4 }
  0xb3   :  { %v549_v13 = vadd.f32 %v548_v60, %v547_v8  ;;  %v557_v29 = vmul.f32 %v181_v12, %v851_v50  ;;  %v521_v1 = vrot.slane %v520_v24, 1  ;;  %v567_v27 = vmul.f32 %v181_v12, %v833_v7 }
  0xb4   :  { %v530_v26 = vrot.slane %v529_v61, 2  ;;  %v577_v2 = vmul.f32 %v180_v23, %v836_v10  ;;  %v512_v30 = vadd.f32 %v511_v63, %v510_v9  ;;  %v540_v16 = vadd.f32 %v539_v0, %v538_v59 }
  0xb5   :  { %v550_v3 = vrot.slane %v549_v13, 2  ;;  %v558_v4 = vadd.f32 %v557_v29, %v556_v25  ;;  %v522_v5 = vadd.f32 %v521_v1, %v520_v24  ;;  %v568_v14 = vadd.f32 %v567_v27, %v566_v62 }
  0xb6   :  { %v531_v55 = vadd.f32 %v530_v26, %v529_v61  ;;  %v578_v56 = vmul.f32 %v181_v12, %v839_v11  ;;  %513 = vst [vmem:[#allocation5 + $0x28] sm:$0x1] %v512_v30  ;;  %v541_v28 = vrot.slane %v540_v16, 2  ;;  %v588_v50 = vadd.f32 %v181_v12, %v180_v23 }
  0xb7   :  { %v551_v17 = vadd.f32 %v550_v3, %v549_v13  ;;  %v559_v31 = vrot.slane %v558_v4, 4  ;;  %523 = vst [vmem:[#allocation5 + $0x29] sm:$0x1] %v522_v5  ;;  %524 = vst [vmem:[#allocation5 + $0x31] sm:$0x1] %v522_v5  ;;  %v569_v57 = vrot.slane %v568_v14, 4  ;;  %v597_v18 = vmul.f32 %v855_v51, %v830_v6 }
  0xb8   :  { %v532_v20 = vrot.slane %v531_v55, 1  ;;  %v579_v21 = vadd.f32 %v578_v56, %v577_v2  ;;  %v542_v32 = vadd.f32 %v541_v28, %v540_v16  ;;  %v589_v19 = vrot.slane %v588_v50, 4 }
  0xb9   :  { %v552_v15 = vrot.slane %v551_v17, 1  ;;  %v560_v33 = vadd.f32 %v559_v31, %v558_v4  ;;  %v570_v35 = vadd.f32 %v569_v57, %v568_v14  ;;  %v598_v37 = vmul.f32 %v859_v52, %v833_v7 }
  0xba   :  { %v533_v34 = vadd.f32 %v532_v20, %v531_v55  ;;  %v580_v36 = vrot.slane %v579_v21, 4  ;;  %v543_v38 = vrot.slane %v542_v32, 1  ;;  %v590_v41 = vadd.f32 %v589_v19, %v588_v50 }
  0xbb   :  { %v553_v39 = vadd.f32 %v552_v15, %v551_v17  ;;  %v561_v40 = vrot.slane %v560_v33, 2  ;;  %v571_v42 = vrot.slane %v570_v35, 2  ;;  %v599_v44 = vadd.f32 %v598_v37, %v597_v18 }
  0xbc   :  { %534 = vst [vmem:[#allocation5 + $0x2a] sm:$0x1] %v533_v34  ;;  %535 = vst [vmem:[#allocation5 + $0x3a] sm:$0x1] %v533_v34  ;;  %v581_v43 = vadd.f32 %v580_v36, %v579_v21  ;;  %v607_v6 = vmul.f32 %v855_v51, %v836_v10  ;;  %v544_v45 = vadd.f32 %v543_v38, %v542_v32  ;;  %v591_v47 = vrot.slane %v590_v41, 2 }
  0xbd   :  { %554 = vst [vmem:[#allocation5 + $0x2c] sm:$0x1] %v553_v39  ;;  %555 = vst [vmem:[#allocation5 + $0x4c] sm:$0x1] %v553_v39  ;;  %v562_v46 = vadd.f32 %v561_v40, %v560_v33  ;;  %v608_v7 = vmul.f32 %v859_v52, %v839_v11  ;;  %v572_v48 = vadd.f32 %v571_v42, %v570_v35  ;;  %v600_v49 = vrot.slane %v599_v44, 4 }
  0xbe   :  { %v582_v8 = vrot.slane %v581_v43, 2  ;;  %v618_v58 = vadd.f32 %v859_v52, %v855_v51  ;;  %545 = vst [vmem:[#allocation5 + $0x2b] sm:$0x1] %v544_v45  ;;  %546 = vst [vmem:[#allocation5 + $0x43] sm:$0x1] %v544_v45  ;;  %v592_v23 = vadd.f32 %v591_v47, %v590_v41  ;;  %v627_v59 = vmul.f32 %v863_v53, %v836_v10 }
  0xbf   :  { %v563_v22 = vrot.slane %v562_v46, 1  ;;  %v609_v9 = vadd.f32 %v608_v7, %v607_v6  ;;  %v573_v60 = vrot.slane %v572_v48, 1  ;;  %v601_v24 = vadd.f32 %v600_v49, %v599_v44 }
  0xc0   :  { %v583_v12 = vadd.f32 %v582_v8, %v581_v43  ;;  %v619_v61 = vrot.slane %v618_v58, 4  ;;  %v593_v62 = vrot.slane %v592_v23, 1  ;;  %v628_v0 = vmul.f32 %v867_v54, %v839_v11 }
  0xc1   :  { %v564_v25 = vadd.f32 %v563_v22, %v562_v46  ;;  %v610_v63 = vrot.slane %v609_v9, 4  ;;  %v574_v13 = vadd.f32 %v573_v60, %v572_v48  ;;  %v602_v52 = vrot.slane %v601_v24, 2 }
  0xc2   :  { %v584_v51 = vrot.slane %v583_v12, 1  ;;  %v620_v29 = vadd.f32 %v619_v61, %v618_v58  ;;  %v594_v1 = vadd.f32 %v593_v62, %v592_v23  ;;  %v629_v27 = vadd.f32 %v628_v0, %v627_v59 }
  0xc3   :  { %565 = vst [vmem:[#allocation5 + $0x32] sm:$0x1] %v564_v25  ;;  %v611_v26 = vadd.f32 %v610_v63, %v609_v9  ;;  %v637_v10 = vadd.f32 %v867_v54, %v863_v53  ;;  %575 = vst [vmem:[#allocation5 + $0x33] sm:$0x1] %v574_v13  ;;  %v603_v30 = vadd.f32 %v602_v52, %v601_v24 }
  0xc4   :  { %576 = vst [vmem:[#allocation5 + $0x3b] sm:$0x1] %v574_v13  ;;  %v585_v2 = vadd.f32 %v584_v51, %v583_v12  ;;  %v621_v16 = vrot.slane %v620_v29, 2  ;;  %595 = vst [vmem:[#allocation5 + $0x35] sm:$0x1] %v594_v1  ;;  %v630_v11 = vrot.slane %v629_v27, 4 }
  0xc5   :  { %596 = vst [vmem:[#allocation5 + $0x4d] sm:$0x1] %v594_v1  ;;  %v612_v3 = vrot.slane %v611_v26, 2  ;;  %v638_v4 = vrot.slane %v637_v10, 4  ;;  %v604_v5 = vrot.slane %v603_v30, 1 }
  0xc6   :  { %586 = vst [vmem:[#allocation5 + $0x34] sm:$0x1] %v585_v2  ;;  %587 = vst [vmem:[#allocation5 + $0x44] sm:$0x1] %v585_v2  ;;  %v622_v55 = vadd.f32 %v621_v16, %v620_v29  ;;  %v631_v56 = vadd.f32 %v630_v11, %v629_v27 }
  0xc7   :  { %v613_v14 = vadd.f32 %v612_v3, %v611_v26  ;;  %v639_v28 = vadd.f32 %v638_v4, %v637_v10  ;;  %v605_v17 = vadd.f32 %v604_v5, %v603_v30 }
  0xc8   :  { %v623_v31 = vrot.slane %v622_v55, 1  ;;  %v632_v54 = vrot.slane %v631_v56, 2 }
  0xc9   :  { %v614_v53 = vrot.slane %v613_v14, 1  ;;  %v640_v50 = vrot.slane %v639_v28, 2  ;;  %606 = vst [vmem:[#allocation5 + $0x3c] sm:$0x1] %v605_v17 }
  0xca   :  { %v624_v20 = vadd.f32 %v623_v31, %v622_v55  ;;  %v633_v21 = vadd.f32 %v632_v54, %v631_v56 }
  0xcb   :  { %v615_v57 = vadd.f32 %v614_v53, %v613_v14  ;;  %v641_v18 = vadd.f32 %v640_v50, %v639_v28 }
  0xcc   :  { %625 = vst [vmem:[#allocation5 + $0x3e] sm:$0x1] %v624_v20  ;;  %626 = vst [vmem:[#allocation5 + $0x4e] sm:$0x1] %v624_v20  ;;  %v634_v32 = vrot.slane %v633_v21, 1 }
  0xcd   :  { %616 = vst [vmem:[#allocation5 + $0x3d] sm:$0x1] %v615_v57  ;;  %617 = vst [vmem:[#allocation5 + $0x45] sm:$0x1] %v615_v57  ;;  %v642_v15 = vrot.slane %v641_v18, 1 }
  0xce   :  { %v635_v33 = vadd.f32 %v634_v32, %v633_v21 }
  0xcf   :  { %v643_v19 = vadd.f32 %v642_v15, %v641_v18 }
  0xd0   :  { %636 = vst [vmem:[#allocation5 + $0x46] sm:$0x1] %v635_v33 }
  0xd1   :  { %644 = vst [vmem:[#allocation5 + $0x47] sm:$0x1] %v643_v19  ;;  %645 = vst [vmem:[#allocation5 + $0x4f] sm:$0x1] %v643_v19 }
  0xd2   :  { %728 = shalt.err (!%p725_p12)
}
  0xd3   :  { %s729_s24 = scalar_lea.hbm %s1091_s1, 1408 }
  0xd4   :  { %p730_p13 = scmp.ne.s32.totalorder %s1091_s1, %s729_s24  ;;  %p733_p0 = scmp.lt.u32.totalorder %s729_s24, %s1091_s1 }
  0xd6   :  { %p735_p1 = pnand %p733_p0, %p730_p13 }
  0xd8   :  { %738 = shalt.err (!%p735_p1)
}
  0xd9   :  { %672 = dma.vmem_to_hbm [thread:$0]  %s667_s20, 1408, %s1091_s1, [#allocation4], %s744_s16, %s744_s16, %s745_s17  }
  0xda   :  { %741 = dma.done.wait [#allocation4], 1408  }
  0xdb   :  { %742 = vsyncadd [#allocation4], 4294965888 }
  0xdc   :  { %676 = vsyncpa [#allocation3], 1 }
  0xdd   :  { %677 = vsyncpa [#allocation4], 1 }

</bundles_post_ra>
